<compile_context>
chip_gen: v6e
topology: v6e:2x2x1
jax: 0.10.0
libtpu: 0.0.40
codegen_flags: <defaults>
</compile_context>

<pallas_src>
import math

import numpy as np
import jax
import jax.numpy as jnp
from jax.experimental import pallas as pl
from jax.experimental.pallas import tpu as pltpu


def _round_up(x, m):
    return ((x + m - 1) // m) * m


def gcn_s_matmul_kernel(w_ref, s_ref, d_ref, o_ref, acc_ref):
    """One (i, k) grid step of:  out[i] = d[i] * sum_k W[i, k] @ scaled[k]."""
    k = pl.program_id(1)

    @pl.when(k == 0)
    def _():
        acc_ref[...] = jnp.zeros_like(acc_ref)

    # bf16 operands on the MXU, f32 accumulation.
    w_tile = w_ref[...].astype(s_ref.dtype)
    acc_ref[...] += jnp.dot(w_tile, s_ref[...],
                            preferred_element_type=jnp.float32)

    @pl.when(k == pl.num_programs(1) - 1)
    def _():
        # Row-side degree scaling fused into the epilogue (output is f32,
        # so no cast needed).
        o_ref[...] = d_ref[...] * acc_ref[...]


def gcn_s_forward(weighted_matrix, feature_matrix, weight,
                  *, tm=256, tk=512, compute_dtype=jnp.bfloat16):
    """GCN_S forward. W: (N, N), X: (N, F_in), weight: (F_in, F_out)."""
    n = weighted_matrix.shape[0]
    f_in, f_out = weight.shape

    # --- cheap preprocessing (XLA): read-once rowsum + tiny dense matmul -----
    # d = (1 + rowsum(W))^-1/2 ; support = X @ weight ; scaled = d * support.
    d = jax.lax.rsqrt(1.0 + jnp.sum(weighted_matrix, axis=1, keepdims=True))
    support = jnp.dot(feature_matrix, weight,
                      preferred_element_type=jnp.float32)
    scaled = d * support                                    # (N, F_out) f32

    # --- padding: lane-dense output width, grid-divisible node count --------
    fp = _round_up(max(f_out, 128), 128)                    # lane-dense stores
    tk = min(tk, _round_up(n, 128))                         # W tile lane dim
    tm = min(tm, _round_up(n, 8))                           # W tile sublane dim
    n_pad = _round_up(n, math.lcm(tm, tk))

    w_p = weighted_matrix
    if n_pad != n:
        w_p = jnp.pad(w_p, ((0, n_pad - n), (0, n_pad - n)))
    d_p = d if n_pad == n else jnp.pad(d, ((0, n_pad - n), (0, 0)))
    s_p = jnp.pad(scaled, ((0, n_pad - n), (0, fp - f_out))).astype(compute_dtype)

    grid = (n_pad // tm, n_pad // tk)

    out_p = pl.pallas_call(
        gcn_s_matmul_kernel,
        out_shape=jax.ShapeDtypeStruct((n_pad, fp), jnp.float32),
        grid_spec=pltpu.PrefetchScalarGridSpec(
            num_scalar_prefetch=0,
            grid=grid,
            in_specs=[
                pl.BlockSpec((tm, tk), lambda i, k: (i, k)),   # W tile (streamed)
                pl.BlockSpec((tk, fp), lambda i, k: (k, 0)),   # d-scaled support
                pl.BlockSpec((tm, 1), lambda i, k: (i, 0)),    # d, row side
            ],
            out_specs=pl.BlockSpec((tm, fp), lambda i, k: (i, 0)),
            scratch_shapes=[pltpu.VMEM((tm, fp), jnp.float32)],
        ),
        compiler_params=pltpu.CompilerParams(
            dimension_semantics=("parallel", "arbitrary")),
    )(w_p, s_p, d_p)

    return out_p[:n, :f_out]


def glorot_init(key, in_features, out_features):
    # Matches the PyTorch glorot_init: uniform in [-r, r], r = sqrt(6/(in+out)).
    init_range = np.sqrt(6.0 / (in_features + out_features))
    return jax.random.uniform(
        key, (in_features, out_features), dtype=jnp.float32,
        minval=-init_range, maxval=init_range,
    )


def reference_forward(weighted_matrix, feature_matrix, weight):
    d = (1.0 + jnp.sum(weighted_matrix, axis=1)) ** -0.5
    norm_w = d[:, None] * weighted_matrix * d[None, :]
    return norm_w @ (feature_matrix @ weight)


if __name__ == "__main__":
    key = jax.random.PRNGKey(0)
    k_w, k_x, k_p = jax.random.split(key, 3)

    # Small-but-representative sizes. N is deliberately NOT a tile multiple and
    # F_out < 128, so the node-padding and lane-densification paths are both
    # exercised, and the grid has multiple row and contraction tiles.
    N = 640
    IN_FEATS = 96
    OUT_FEATS = 48

    weighted_matrix = jax.random.uniform(k_w, (N, N), dtype=jnp.float32)
    feature_matrix = jax.random.normal(k_x, (N, IN_FEATS), dtype=jnp.float32)
    weight = glorot_init(k_p, IN_FEATS, OUT_FEATS)

    fwd = jax.jit(gcn_s_forward)
    out = jax.block_until_ready(fwd(weighted_matrix, feature_matrix, weight))
    assert out.shape == (N, OUT_FEATS)

    ref = reference_forward(weighted_matrix, feature_matrix, weight)
    # bf16 MXU operands with f32 accumulation -> loose-ish but meaningful tol.
    np.testing.assert_allclose(np.asarray(out), np.asarray(ref),
                               rtol=2e-2, atol=5e-3)

    print("KERNEL_OK")
</pallas_src>

<mosaic_0001>
module attributes {stable_mosaic.version = 11 : i64} {
  func.func @gcn_s_matmul_kernel(%arg0: i32, %arg1: i32, %arg2: memref<256x512xf32, #tpu.memory_space<vmem>>, %arg3: memref<512x128xbf16, #tpu.memory_space<vmem>>, %arg4: memref<256x1xf32, #tpu.memory_space<vmem>>, %arg5: memref<256x128xf32, #tpu.memory_space<vmem>>, %arg6: memref<256x128xf32, #tpu.memory_space<vmem>>) attributes {dimension_semantics = [#tpu.dimension_semantics<parallel>, #tpu.dimension_semantics<arbitrary>], iteration_bounds = array<i64: 4, 2>, scalar_prefetch = 0 : i64, scratch_operands = 1 : i64, tpu.core_type = #tpu.core_type<tc>, window_params = [{transform_indices = @transform_0, window_bounds = array<i64: 256, 512>}, {transform_indices = @transform_1, window_bounds = array<i64: 512, 128>}, {transform_indices = @transform_2, window_bounds = array<i64: 256, 1>}, {transform_indices = @transform_3, window_bounds = array<i64: 256, 128>}]} {
    %c0_i32 = arith.constant 0 : i32
    %0 = arith.cmpi eq, %arg1, %c0_i32 : i32
    %1 = arith.extui %0 : i1 to i32
    %c0_i32_0 = arith.constant 0 : i32
    %2 = arith.cmpi ne, %1, %c0_i32_0 : i32
    scf.if %2 {
      %cst_9 = arith.constant 0.000000e+00 : f32
      %13 = vector.broadcast %cst_9 : f32 to vector<256x128xf32>
      %c0_10 = arith.constant 0 : index
      %c0_11 = arith.constant 0 : index
      %14 = vector.load %arg6[%c0_10, %c0_11] : memref<256x128xf32, #tpu.memory_space<vmem>>, vector<256x128xf32>
      tpu.vector_store %arg6[%c0_10, %c0_11], %13 {strides = array<i32>} : memref<256x128xf32, #tpu.memory_space<vmem>>, vector<256x128xf32>,
    } else {
    }
    %c0 = arith.constant 0 : index
    %c0_1 = arith.constant 0 : index
    %3 = vector.load %arg2[%c0, %c0_1] : memref<256x512xf32, #tpu.memory_space<vmem>>, vector<256x512xf32>
    %4 = arith.truncf %3 : vector<256x512xf32> to vector<256x512xbf16>
    %c0_2 = arith.constant 0 : index
    %c0_3 = arith.constant 0 : index
    %5 = vector.load %arg6[%c0_2, %c0_3] : memref<256x128xf32, #tpu.memory_space<vmem>>, vector<256x128xf32>
    %c0_4 = arith.constant 0 : index
    %c0_5 = arith.constant 0 : index
    %6 = vector.load %arg3[%c0_4, %c0_5] : memref<512x128xbf16, #tpu.memory_space<vmem>>, vector<512x128xbf16>
    %cst = arith.constant dense<0.000000e+00> : vector<256x128xf32>
    %7 = tpu.matmul %4, %6, %cst {dimension_numbers = #tpu.dot_dimension_numbers<[1], [0], [0], [1], [0, 0, 1, 1], [], []>} : vector<256x512xbf16>, vector<512x128xbf16>, vector<256x128xf32> -> vector<256x128xf32>
    %8 = arith.addf %5, %7 : vector<256x128xf32>
    %c0_6 = arith.constant 0 : index
    %c0_7 = arith.constant 0 : index
    %9 = vector.load %arg6[%c0_6, %c0_7] : memref<256x128xf32, #tpu.memory_space<vmem>>, vector<256x128xf32>
    tpu.vector_store %arg6[%c0_6, %c0_7], %8 {strides = array<i32>} : memref<256x128xf32, #tpu.memory_space<vmem>>, vector<256x128xf32>,
    %c1_i32 = arith.constant 1 : i32
    %10 = arith.cmpi eq, %arg1, %c1_i32 : i32
    %11 = arith.extui %10 : i1 to i32
    %c0_i32_8 = arith.constant 0 : i32
    %12 = arith.cmpi ne, %11, %c0_i32_8 : i32
    scf.if %12 {
      %c0_9 = arith.constant 0 : index
      %c0_10 = arith.constant 0 : index
      %13 = vector.load %arg4[%c0_9, %c0_10] : memref<256x1xf32, #tpu.memory_space<vmem>>, vector<256x1xf32>
      %c0_11 = arith.constant 0 : index
      %c0_12 = arith.constant 0 : index
      %14 = vector.load %arg6[%c0_11, %c0_12] : memref<256x128xf32, #tpu.memory_space<vmem>>, vector<256x128xf32>
      %15 = vector.broadcast %13 : vector<256x1xf32> to vector<256x128xf32>
      %16 = arith.mulf %15, %14 : vector<256x128xf32>
      %c0_13 = arith.constant 0 : index
      %c0_14 = arith.constant 0 : index
      %17 = vector.load %arg5[%c0_13, %c0_14] : memref<256x128xf32, #tpu.memory_space<vmem>>, vector<256x128xf32>
      tpu.vector_store %arg5[%c0_13, %c0_14], %16 {strides = array<i32>} : memref<256x128xf32, #tpu.memory_space<vmem>>, vector<256x128xf32>,
    } else {
    }
    return
  }
  func.func @transform_0(%arg0: i32, %arg1: i32) -> (i32, i32) {
    %c0_i32 = arith.constant 0 : i32
    return %arg0, %arg1 : i32, i32
  }
  func.func @transform_1(%arg0: i32, %arg1: i32) -> (i32, i32) {
    %c0_i32 = arith.constant 0 : i32
    %c0_i32_0 = arith.constant 0 : i32
    return %arg1, %c0_i32 : i32, i32
  }
  func.func @transform_2(%arg0: i32, %arg1: i32) -> (i32, i32) {
    %c0_i32 = arith.constant 0 : i32
    %c0_i32_0 = arith.constant 0 : i32
    return %arg0, %c0_i32 : i32, i32
  }
  func.func @transform_3(%arg0: i32, %arg1: i32) -> (i32, i32) {
    %c0_i32 = arith.constant 0 : i32
    %c0_i32_0 = arith.constant 0 : i32
    return %arg0, %c0_i32 : i32, i32
  }
}

</mosaic_0001>

<bundles_post_ra>
// kernel: gcn_s_forward.1
= control target key start
LH: loop header
LB: loop body
LE: loop exit
PB: predicated region body
PF: predicated region fallthrough
CT: control target
= control target key end

     0   :  { %s2253_s12 = smov 0   ;;  %s2255_s13 = smov 0   ;;  %s2842_s0 = inlined_call_operand.vmem [shape: f32[1024,1024], index: 0, kind: input, shape index: {}]   ;;  %s2843_s1 = inlined_call_operand.vmem [shape: bf16[1024,128], index: 1, kind: input, shape index: {}]   ;;  %s2844_s2 = inlined_call_operand.vmem [shape: f32[1024,1], index: 2, kind: input, shape index: {}]   ;;  %s2845_s3 = inlined_call_operand.vmem [shape: f32[1024,128], index: 3, kind: output, shape index: {}]  }
   0x1   :  { %s2257_s14 = smov 0   ;;  %s2259_s15 = smov 0  }
   0x2   :  { %s2261_s16 = smov 0   ;;  %s2263_s17 = smov 0  }
   0x3   :  { %s2265_s18 = smov 0  }
   0x4 LB: > { %s22_s19 = sadd.s32 1, %s2221_s16  ;;  %s25_s20 = sadd.s32 1, %s2225_s17  ;;  %s2229_s18 = sphi %s2265_s18, %s13_s18   ;;  %s2225_s17 = sphi %s2263_s17, %s2851_s17   ;;  %s2221_s16 = sphi %s2261_s16, %s2850_s16   ;;  %s2217_s15 = sphi %s2259_s15, %s2849_s15   ;;  %s2213_s14 = sphi %s2257_s14, %s2848_s14   ;;  %s2209_s13 = sphi %s2255_s13, %s2847_s13   ;;  %s2205_s12 = sphi %s2253_s12, %s2846_s12  }
   0x5   : > { %p23_p0 = scmp.ge.s32.totalorder %s22_s19, 2  ;;  %p41_p1 = scmp.ne.s32.totalorder %s2209_s13, %s2205_s12 }
   0x6   : > { %p42_p2 = scmp.eq.s32.totalorder %s2229_s18, 0  ;;  %s34_s24 = sadd.s32 1, %s2209_s13 }
   0x7   : > { %s2853_s19 = smov (%p23_p0, %s22_s19), 0  ;;  %s2855_s20 = smov (!%p23_p0, %s25_s20), %s2225_s17 }
   0x8   : > { %p43_p3 = por %p42_p2, %p41_p1  ;;  %p27_p4 = scmp.ge.s32.totalorder %s2855_s20, 4 }
   0x9   : > { %s30_s21 = ssub.s32 %s2221_s16, %s2853_s19  ;;  %p1808_p6 = scmp.ge.s32.totalorder %s2229_s18, 8 }
   0xa   : > { %s2857_s20 = smov (%p27_p4, %s2855_s20), 0 }
   0xb   : > { %s29_s22 = ssub.s32 %s2225_s17, %s2857_s20  ;;  %145 = sbr.rel (%p1808_p6) target bundleno = 87 (0x57), region = 16 }
   0xc   : > { %s31_s23 = sor.u32 %s30_s21, %s29_s22 }
   0xd   : > { %p32_p5 = scmp.eq.s32.totalorder %s31_s23, 0 }
   0xf   : > { %s2304_s25 = scalar_select %p32_p5, %s2209_s13, %s34_s24  }
  0x10   : > { %148 = sbr.rel (!%p43_p3) target bundleno = 87 (0x57), region = 20  ;;  %s150_s26 = sand.u32 (%p43_p3), 1, %s2209_s13  }
  0x11   : > { %s1811_s27 = sshll.u32 (%p43_p3), %s2221_s16, 2  ;;  %s1809_s28 = sshll.u32 (%p43_p3), %s150_s26, 10 }
  0x12   : > { %s1858_s29 = sshll.u32 (%p43_p3), %s2225_s17, 8  ;;  %s2318_s8 = scalar_lea.vmem (%p43_p3), [#allocation3], %s1809_s28 }
  0x13   : > { %s156_s30 = sadd.s32 (%p43_p3), %s1858_s29, %s1811_s27 }
  0x14   : > { %s1813_s4 = sshll.u32 (%p43_p3), %s156_s30, 3 }
  0x15   : > { %s2313_s7 = scalar_lea.vmem %s2842_s0, %s1813_s4 }
  0x16   : > { %v171_v0 = vld [vmem:[%s2313_s7] sm:$0xff]  ;;  %v173_v1 = vld [vmem:[%s2313_s7 + $0x8] sm:$0xff]  ;;  %v175_v2 = vld [vmem:[%s2313_s7 + $0x10] sm:$0xff] }
  0x17   : > { %172 = vst [vmem:[%s2318_s8] sm:$0xff] %v171_v0  ;;  %174 = vst [vmem:[%s2318_s8 + $0x8] sm:$0xff] %v173_v1  ;;  %v177_v3 = vld [vmem:[%s2313_s7 + $0x18] sm:$0xff]  ;;  %v179_v4 = vld [vmem:[%s2313_s7 + $0x40] sm:$0xff] }
  0x18   : > { %176 = vst [vmem:[%s2318_s8 + $0x10] sm:$0xff] %v175_v2  ;;  %v181_v5 = vld [vmem:[%s2313_s7 + $0x48] sm:$0xff]  ;;  %178 = vst [vmem:[%s2318_s8 + $0x18] sm:$0xff] %v177_v3  ;;  %v183_v6 = vld [vmem:[%s2313_s7 + $0x50] sm:$0xff] }
  0x19   : > { %180 = vst [vmem:[%s2318_s8 + $0x20] sm:$0xff] %v179_v4  ;;  %182 = vst [vmem:[%s2318_s8 + $0x28] sm:$0xff] %v181_v5  ;;  %v185_v7 = vld [vmem:[%s2313_s7 + $0x58] sm:$0xff]  ;;  %v187_v8 = vld [vmem:[%s2313_s7 + $0x80] sm:$0xff] }
  0x1a   : > { %184 = vst [vmem:[%s2318_s8 + $0x30] sm:$0xff] %v183_v6  ;;  %186 = vst [vmem:[%s2318_s8 + $0x38] sm:$0xff] %v185_v7  ;;  %v189_v9 = vld [vmem:[%s2313_s7 + $0x88] sm:$0xff]  ;;  %v191_v10 = vld [vmem:[%s2313_s7 + $0x90] sm:$0xff] }
  0x1b   : > { %188 = vst [vmem:[%s2318_s8 + $0x40] sm:$0xff] %v187_v8  ;;  %v193_v11 = vld [vmem:[%s2313_s7 + $0x98] sm:$0xff]  ;;  %190 = vst [vmem:[%s2318_s8 + $0x48] sm:$0xff] %v189_v9  ;;  %v195_v12 = vld [vmem:[%s2313_s7 + $0xc0] sm:$0xff] }
  0x1c   : > { %192 = vst [vmem:[%s2318_s8 + $0x50] sm:$0xff] %v191_v10  ;;  %194 = vst [vmem:[%s2318_s8 + $0x58] sm:$0xff] %v193_v11  ;;  %v197_v13 = vld [vmem:[%s2313_s7 + $0xc8] sm:$0xff]  ;;  %v199_v14 = vld [vmem:[%s2313_s7 + $0xd0] sm:$0xff] }
  0x1d   : > { %196 = vst [vmem:[%s2318_s8 + $0x60] sm:$0xff] %v195_v12  ;;  %198 = vst [vmem:[%s2318_s8 + $0x68] sm:$0xff] %v197_v13  ;;  %v201_v15 = vld [vmem:[%s2313_s7 + $0xd8] sm:$0xff]  ;;  %v203_v16 = vld [vmem:[%s2313_s7 + $0x100] sm:$0xff] }
  0x1e   : > { %200 = vst [vmem:[%s2318_s8 + $0x70] sm:$0xff] %v199_v14  ;;  %v205_v17 = vld [vmem:[%s2313_s7 + $0x108] sm:$0xff]  ;;  %202 = vst [vmem:[%s2318_s8 + $0x78] sm:$0xff] %v201_v15  ;;  %v207_v18 = vld [vmem:[%s2313_s7 + $0x110] sm:$0xff] }
  0x1f   : > { %204 = vst [vmem:[%s2318_s8 + $0x80] sm:$0xff] %v203_v16  ;;  %206 = vst [vmem:[%s2318_s8 + $0x88] sm:$0xff] %v205_v17  ;;  %v209_v19 = vld [vmem:[%s2313_s7 + $0x118] sm:$0xff]  ;;  %v211_v20 = vld [vmem:[%s2313_s7 + $0x140] sm:$0xff] }
  0x20   : > { %208 = vst [vmem:[%s2318_s8 + $0x90] sm:$0xff] %v207_v18  ;;  %210 = vst [vmem:[%s2318_s8 + $0x98] sm:$0xff] %v209_v19  ;;  %v213_v21 = vld [vmem:[%s2313_s7 + $0x148] sm:$0xff]  ;;  %v215_v22 = vld [vmem:[%s2313_s7 + $0x150] sm:$0xff] }
  0x21   : > { %212 = vst [vmem:[%s2318_s8 + $0xa0] sm:$0xff] %v211_v20  ;;  %v217_v23 = vld [vmem:[%s2313_s7 + $0x158] sm:$0xff]  ;;  %214 = vst [vmem:[%s2318_s8 + $0xa8] sm:$0xff] %v213_v21  ;;  %v219_v24 = vld [vmem:[%s2313_s7 + $0x180] sm:$0xff] }
  0x22   : > { %216 = vst [vmem:[%s2318_s8 + $0xb0] sm:$0xff] %v215_v22  ;;  %218 = vst [vmem:[%s2318_s8 + $0xb8] sm:$0xff] %v217_v23  ;;  %v221_v25 = vld [vmem:[%s2313_s7 + $0x188] sm:$0xff]  ;;  %v223_v26 = vld [vmem:[%s2313_s7 + $0x190] sm:$0xff] }
  0x23   : > { %220 = vst [vmem:[%s2318_s8 + $0xc0] sm:$0xff] %v219_v24  ;;  %222 = vst [vmem:[%s2318_s8 + $0xc8] sm:$0xff] %v221_v25  ;;  %v225_v27 = vld [vmem:[%s2313_s7 + $0x198] sm:$0xff]  ;;  %v227_v28 = vld [vmem:[%s2313_s7 + $0x1c0] sm:$0xff] }
  0x24   : > { %224 = vst [vmem:[%s2318_s8 + $0xd0] sm:$0xff] %v223_v26  ;;  %v229_v29 = vld [vmem:[%s2313_s7 + $0x1c8] sm:$0xff]  ;;  %226 = vst [vmem:[%s2318_s8 + $0xd8] sm:$0xff] %v225_v27  ;;  %v231_v30 = vld [vmem:[%s2313_s7 + $0x1d0] sm:$0xff] }
  0x25   : > { %228 = vst [vmem:[%s2318_s8 + $0xe0] sm:$0xff] %v227_v28  ;;  %230 = vst [vmem:[%s2318_s8 + $0xe8] sm:$0xff] %v229_v29  ;;  %v233_v31 = vld [vmem:[%s2313_s7 + $0x1d8] sm:$0xff]  ;;  %v235_v32 = vld [vmem:[%s2313_s7 + $0x200] sm:$0xff] }
  0x26   : > { %232 = vst [vmem:[%s2318_s8 + $0xf0] sm:$0xff] %v231_v30  ;;  %234 = vst [vmem:[%s2318_s8 + $0xf8] sm:$0xff] %v233_v31  ;;  %v237_v33 = vld [vmem:[%s2313_s7 + $0x208] sm:$0xff]  ;;  %v239_v34 = vld [vmem:[%s2313_s7 + $0x210] sm:$0xff] }
  0x27   : > { %236 = vst [vmem:[%s2318_s8 + $0x100] sm:$0xff] %v235_v32  ;;  %v241_v35 = vld [vmem:[%s2313_s7 + $0x218] sm:$0xff]  ;;  %238 = vst [vmem:[%s2318_s8 + $0x108] sm:$0xff] %v237_v33  ;;  %v243_v36 = vld [vmem:[%s2313_s7 + $0x240] sm:$0xff] }
  0x28   : > { %240 = vst [vmem:[%s2318_s8 + $0x110] sm:$0xff] %v239_v34  ;;  %242 = vst [vmem:[%s2318_s8 + $0x118] sm:$0xff] %v241_v35  ;;  %v245_v37 = vld [vmem:[%s2313_s7 + $0x248] sm:$0xff]  ;;  %v247_v38 = vld [vmem:[%s2313_s7 + $0x250] sm:$0xff] }
  0x29   : > { %244 = vst [vmem:[%s2318_s8 + $0x120] sm:$0xff] %v243_v36  ;;  %246 = vst [vmem:[%s2318_s8 + $0x128] sm:$0xff] %v245_v37  ;;  %v249_v39 = vld [vmem:[%s2313_s7 + $0x258] sm:$0xff]  ;;  %v251_v40 = vld [vmem:[%s2313_s7 + $0x280] sm:$0xff] }
  0x2a   : > { %248 = vst [vmem:[%s2318_s8 + $0x130] sm:$0xff] %v247_v38  ;;  %v253_v41 = vld [vmem:[%s2313_s7 + $0x288] sm:$0xff]  ;;  %250 = vst [vmem:[%s2318_s8 + $0x138] sm:$0xff] %v249_v39  ;;  %v255_v42 = vld [vmem:[%s2313_s7 + $0x290] sm:$0xff] }
  0x2b   : > { %252 = vst [vmem:[%s2318_s8 + $0x140] sm:$0xff] %v251_v40  ;;  %254 = vst [vmem:[%s2318_s8 + $0x148] sm:$0xff] %v253_v41  ;;  %v257_v43 = vld [vmem:[%s2313_s7 + $0x298] sm:$0xff]  ;;  %v259_v44 = vld [vmem:[%s2313_s7 + $0x2c0] sm:$0xff] }
  0x2c   : > { %256 = vst [vmem:[%s2318_s8 + $0x150] sm:$0xff] %v255_v42  ;;  %258 = vst [vmem:[%s2318_s8 + $0x158] sm:$0xff] %v257_v43  ;;  %v261_v45 = vld [vmem:[%s2313_s7 + $0x2c8] sm:$0xff]  ;;  %v263_v46 = vld [vmem:[%s2313_s7 + $0x2d0] sm:$0xff] }
  0x2d   : > { %260 = vst [vmem:[%s2318_s8 + $0x160] sm:$0xff] %v259_v44  ;;  %v265_v47 = vld [vmem:[%s2313_s7 + $0x2d8] sm:$0xff]  ;;  %262 = vst [vmem:[%s2318_s8 + $0x168] sm:$0xff] %v261_v45  ;;  %v267_v48 = vld [vmem:[%s2313_s7 + $0x300] sm:$0xff] }
  0x2e   : > { %264 = vst [vmem:[%s2318_s8 + $0x170] sm:$0xff] %v263_v46  ;;  %266 = vst [vmem:[%s2318_s8 + $0x178] sm:$0xff] %v265_v47  ;;  %v269_v49 = vld [vmem:[%s2313_s7 + $0x308] sm:$0xff]  ;;  %v271_v50 = vld [vmem:[%s2313_s7 + $0x310] sm:$0xff] }
  0x2f   : > { %268 = vst [vmem:[%s2318_s8 + $0x180] sm:$0xff] %v267_v48  ;;  %270 = vst [vmem:[%s2318_s8 + $0x188] sm:$0xff] %v269_v49  ;;  %v273_v51 = vld [vmem:[%s2313_s7 + $0x318] sm:$0xff]  ;;  %v275_v52 = vld [vmem:[%s2313_s7 + $0x340] sm:$0xff] }
  0x30   : > { %272 = vst [vmem:[%s2318_s8 + $0x190] sm:$0xff] %v271_v50  ;;  %v277_v53 = vld [vmem:[%s2313_s7 + $0x348] sm:$0xff]  ;;  %274 = vst [vmem:[%s2318_s8 + $0x198] sm:$0xff] %v273_v51  ;;  %v279_v54 = vld [vmem:[%s2313_s7 + $0x350] sm:$0xff] }
  0x31   : > { %276 = vst [vmem:[%s2318_s8 + $0x1a0] sm:$0xff] %v275_v52  ;;  %278 = vst [vmem:[%s2318_s8 + $0x1a8] sm:$0xff] %v277_v53  ;;  %v281_v55 = vld [vmem:[%s2313_s7 + $0x358] sm:$0xff]  ;;  %v283_v56 = vld [vmem:[%s2313_s7 + $0x380] sm:$0xff] }
  0x32   : > { %280 = vst [vmem:[%s2318_s8 + $0x1b0] sm:$0xff] %v279_v54  ;;  %282 = vst [vmem:[%s2318_s8 + $0x1b8] sm:$0xff] %v281_v55  ;;  %v285_v57 = vld [vmem:[%s2313_s7 + $0x388] sm:$0xff]  ;;  %v287_v58 = vld [vmem:[%s2313_s7 + $0x390] sm:$0xff] }
  0x33   : > { %284 = vst [vmem:[%s2318_s8 + $0x1c0] sm:$0xff] %v283_v56  ;;  %v289_v59 = vld [vmem:[%s2313_s7 + $0x398] sm:$0xff]  ;;  %286 = vst [vmem:[%s2318_s8 + $0x1c8] sm:$0xff] %v285_v57  ;;  %v291_v60 = vld [vmem:[%s2313_s7 + $0x3c0] sm:$0xff] }
  0x34   : > { %288 = vst [vmem:[%s2318_s8 + $0x1d0] sm:$0xff] %v287_v58  ;;  %290 = vst [vmem:[%s2318_s8 + $0x1d8] sm:$0xff] %v289_v59  ;;  %v293_v61 = vld [vmem:[%s2313_s7 + $0x3c8] sm:$0xff]  ;;  %v295_v62 = vld [vmem:[%s2313_s7 + $0x3d0] sm:$0xff] }
  0x35   : > { %292 = vst [vmem:[%s2318_s8 + $0x1e0] sm:$0xff] %v291_v60  ;;  %294 = vst [vmem:[%s2318_s8 + $0x1e8] sm:$0xff] %v293_v61  ;;  %v297_v63 = vld [vmem:[%s2313_s7 + $0x3d8] sm:$0xff]  ;;  %v299_v0 = vld [vmem:[%s2313_s7 + $0x400] sm:$0xff] }
  0x36   : > { %296 = vst [vmem:[%s2318_s8 + $0x1f0] sm:$0xff] %v295_v62  ;;  %v301_v1 = vld [vmem:[%s2313_s7 + $0x408] sm:$0xff]  ;;  %298 = vst [vmem:[%s2318_s8 + $0x1f8] sm:$0xff] %v297_v63  ;;  %v303_v2 = vld [vmem:[%s2313_s7 + $0x410] sm:$0xff] }
  0x37   : > { %300 = vst [vmem:[%s2318_s8 + $0x200] sm:$0xff] %v299_v0  ;;  %302 = vst [vmem:[%s2318_s8 + $0x208] sm:$0xff] %v301_v1  ;;  %v305_v3 = vld [vmem:[%s2313_s7 + $0x418] sm:$0xff]  ;;  %v307_v4 = vld [vmem:[%s2313_s7 + $0x440] sm:$0xff] }
  0x38   : > { %304 = vst [vmem:[%s2318_s8 + $0x210] sm:$0xff] %v303_v2  ;;  %306 = vst [vmem:[%s2318_s8 + $0x218] sm:$0xff] %v305_v3  ;;  %v309_v5 = vld [vmem:[%s2313_s7 + $0x448] sm:$0xff]  ;;  %v311_v6 = vld [vmem:[%s2313_s7 + $0x450] sm:$0xff] }
  0x39   : > { %308 = vst [vmem:[%s2318_s8 + $0x220] sm:$0xff] %v307_v4  ;;  %v313_v7 = vld [vmem:[%s2313_s7 + $0x458] sm:$0xff]  ;;  %310 = vst [vmem:[%s2318_s8 + $0x228] sm:$0xff] %v309_v5  ;;  %v315_v8 = vld [vmem:[%s2313_s7 + $0x480] sm:$0xff] }
  0x3a   : > { %312 = vst [vmem:[%s2318_s8 + $0x230] sm:$0xff] %v311_v6  ;;  %314 = vst [vmem:[%s2318_s8 + $0x238] sm:$0xff] %v313_v7  ;;  %v317_v9 = vld [vmem:[%s2313_s7 + $0x488] sm:$0xff]  ;;  %v319_v10 = vld [vmem:[%s2313_s7 + $0x490] sm:$0xff] }
  0x3b   : > { %316 = vst [vmem:[%s2318_s8 + $0x240] sm:$0xff] %v315_v8  ;;  %318 = vst [vmem:[%s2318_s8 + $0x248] sm:$0xff] %v317_v9  ;;  %v321_v11 = vld [vmem:[%s2313_s7 + $0x498] sm:$0xff]  ;;  %v323_v12 = vld [vmem:[%s2313_s7 + $0x4c0] sm:$0xff] }
  0x3c   : > { %320 = vst [vmem:[%s2318_s8 + $0x250] sm:$0xff] %v319_v10  ;;  %v325_v13 = vld [vmem:[%s2313_s7 + $0x4c8] sm:$0xff]  ;;  %322 = vst [vmem:[%s2318_s8 + $0x258] sm:$0xff] %v321_v11  ;;  %v327_v14 = vld [vmem:[%s2313_s7 + $0x4d0] sm:$0xff] }
  0x3d   : > { %324 = vst [vmem:[%s2318_s8 + $0x260] sm:$0xff] %v323_v12  ;;  %326 = vst [vmem:[%s2318_s8 + $0x268] sm:$0xff] %v325_v13  ;;  %v329_v15 = vld [vmem:[%s2313_s7 + $0x4d8] sm:$0xff]  ;;  %v331_v16 = vld [vmem:[%s2313_s7 + $0x500] sm:$0xff] }
  0x3e   : > { %328 = vst [vmem:[%s2318_s8 + $0x270] sm:$0xff] %v327_v14  ;;  %330 = vst [vmem:[%s2318_s8 + $0x278] sm:$0xff] %v329_v15  ;;  %v333_v17 = vld [vmem:[%s2313_s7 + $0x508] sm:$0xff]  ;;  %v335_v18 = vld [vmem:[%s2313_s7 + $0x510] sm:$0xff] }
  0x3f   : > { %332 = vst [vmem:[%s2318_s8 + $0x280] sm:$0xff] %v331_v16  ;;  %v337_v19 = vld [vmem:[%s2313_s7 + $0x518] sm:$0xff]  ;;  %334 = vst [vmem:[%s2318_s8 + $0x288] sm:$0xff] %v333_v17  ;;  %v339_v20 = vld [vmem:[%s2313_s7 + $0x540] sm:$0xff] }
  0x40   : > { %336 = vst [vmem:[%s2318_s8 + $0x290] sm:$0xff] %v335_v18  ;;  %338 = vst [vmem:[%s2318_s8 + $0x298] sm:$0xff] %v337_v19  ;;  %v341_v21 = vld [vmem:[%s2313_s7 + $0x548] sm:$0xff]  ;;  %v343_v22 = vld [vmem:[%s2313_s7 + $0x550] sm:$0xff] }
  0x41   : > { %340 = vst [vmem:[%s2318_s8 + $0x2a0] sm:$0xff] %v339_v20  ;;  %342 = vst [vmem:[%s2318_s8 + $0x2a8] sm:$0xff] %v341_v21  ;;  %v345_v23 = vld [vmem:[%s2313_s7 + $0x558] sm:$0xff]  ;;  %v347_v24 = vld [vmem:[%s2313_s7 + $0x580] sm:$0xff] }
  0x42   : > { %344 = vst [vmem:[%s2318_s8 + $0x2b0] sm:$0xff] %v343_v22  ;;  %v349_v25 = vld [vmem:[%s2313_s7 + $0x588] sm:$0xff]  ;;  %346 = vst [vmem:[%s2318_s8 + $0x2b8] sm:$0xff] %v345_v23  ;;  %v351_v26 = vld [vmem:[%s2313_s7 + $0x590] sm:$0xff] }
  0x43   : > { %348 = vst [vmem:[%s2318_s8 + $0x2c0] sm:$0xff] %v347_v24  ;;  %350 = vst [vmem:[%s2318_s8 + $0x2c8] sm:$0xff] %v349_v25  ;;  %v353_v27 = vld [vmem:[%s2313_s7 + $0x598] sm:$0xff]  ;;  %v355_v28 = vld [vmem:[%s2313_s7 + $0x5c0] sm:$0xff] }
  0x44   : > { %352 = vst [vmem:[%s2318_s8 + $0x2d0] sm:$0xff] %v351_v26  ;;  %354 = vst [vmem:[%s2318_s8 + $0x2d8] sm:$0xff] %v353_v27  ;;  %v357_v29 = vld [vmem:[%s2313_s7 + $0x5c8] sm:$0xff]  ;;  %v359_v30 = vld [vmem:[%s2313_s7 + $0x5d0] sm:$0xff] }
  0x45   : > { %356 = vst [vmem:[%s2318_s8 + $0x2e0] sm:$0xff] %v355_v28  ;;  %v361_v31 = vld [vmem:[%s2313_s7 + $0x5d8] sm:$0xff]  ;;  %358 = vst [vmem:[%s2318_s8 + $0x2e8] sm:$0xff] %v357_v29  ;;  %v363_v32 = vld [vmem:[%s2313_s7 + $0x600] sm:$0xff] }
  0x46   : > { %360 = vst [vmem:[%s2318_s8 + $0x2f0] sm:$0xff] %v359_v30  ;;  %362 = vst [vmem:[%s2318_s8 + $0x2f8] sm:$0xff] %v361_v31  ;;  %v365_v33 = vld [vmem:[%s2313_s7 + $0x608] sm:$0xff]  ;;  %v367_v34 = vld [vmem:[%s2313_s7 + $0x610] sm:$0xff] }
  0x47   : > { %364 = vst [vmem:[%s2318_s8 + $0x300] sm:$0xff] %v363_v32  ;;  %366 = vst [vmem:[%s2318_s8 + $0x308] sm:$0xff] %v365_v33  ;;  %v369_v35 = vld [vmem:[%s2313_s7 + $0x618] sm:$0xff]  ;;  %v371_v36 = vld [vmem:[%s2313_s7 + $0x640] sm:$0xff] }
  0x48   : > { %368 = vst [vmem:[%s2318_s8 + $0x310] sm:$0xff] %v367_v34  ;;  %v373_v37 = vld [vmem:[%s2313_s7 + $0x648] sm:$0xff]  ;;  %370 = vst [vmem:[%s2318_s8 + $0x318] sm:$0xff] %v369_v35  ;;  %v375_v38 = vld [vmem:[%s2313_s7 + $0x650] sm:$0xff] }
  0x49   : > { %372 = vst [vmem:[%s2318_s8 + $0x320] sm:$0xff] %v371_v36  ;;  %374 = vst [vmem:[%s2318_s8 + $0x328] sm:$0xff] %v373_v37  ;;  %v377_v39 = vld [vmem:[%s2313_s7 + $0x658] sm:$0xff]  ;;  %v379_v40 = vld [vmem:[%s2313_s7 + $0x680] sm:$0xff] }
  0x4a   : > { %376 = vst [vmem:[%s2318_s8 + $0x330] sm:$0xff] %v375_v38  ;;  %378 = vst [vmem:[%s2318_s8 + $0x338] sm:$0xff] %v377_v39  ;;  %v381_v41 = vld [vmem:[%s2313_s7 + $0x688] sm:$0xff]  ;;  %v383_v42 = vld [vmem:[%s2313_s7 + $0x690] sm:$0xff] }
  0x4b   : > { %380 = vst [vmem:[%s2318_s8 + $0x340] sm:$0xff] %v379_v40  ;;  %v385_v43 = vld [vmem:[%s2313_s7 + $0x698] sm:$0xff]  ;;  %382 = vst [vmem:[%s2318_s8 + $0x348] sm:$0xff] %v381_v41  ;;  %v387_v44 = vld [vmem:[%s2313_s7 + $0x6c0] sm:$0xff] }
  0x4c   : > { %384 = vst [vmem:[%s2318_s8 + $0x350] sm:$0xff] %v383_v42  ;;  %386 = vst [vmem:[%s2318_s8 + $0x358] sm:$0xff] %v385_v43  ;;  %v389_v45 = vld [vmem:[%s2313_s7 + $0x6c8] sm:$0xff]  ;;  %v391_v46 = vld [vmem:[%s2313_s7 + $0x6d0] sm:$0xff] }
  0x4d   : > { %388 = vst [vmem:[%s2318_s8 + $0x360] sm:$0xff] %v387_v44  ;;  %390 = vst [vmem:[%s2318_s8 + $0x368] sm:$0xff] %v389_v45  ;;  %v393_v47 = vld [vmem:[%s2313_s7 + $0x6d8] sm:$0xff]  ;;  %v395_v48 = vld [vmem:[%s2313_s7 + $0x700] sm:$0xff] }
  0x4e   : > { %392 = vst [vmem:[%s2318_s8 + $0x370] sm:$0xff] %v391_v46  ;;  %v397_v49 = vld [vmem:[%s2313_s7 + $0x708] sm:$0xff]  ;;  %394 = vst [vmem:[%s2318_s8 + $0x378] sm:$0xff] %v393_v47  ;;  %v399_v50 = vld [vmem:[%s2313_s7 + $0x710] sm:$0xff] }
  0x4f   : > { %396 = vst [vmem:[%s2318_s8 + $0x380] sm:$0xff] %v395_v48  ;;  %398 = vst [vmem:[%s2318_s8 + $0x388] sm:$0xff] %v397_v49  ;;  %v401_v51 = vld [vmem:[%s2313_s7 + $0x718] sm:$0xff]  ;;  %v403_v52 = vld [vmem:[%s2313_s7 + $0x740] sm:$0xff] }
  0x50   : > { %400 = vst [vmem:[%s2318_s8 + $0x390] sm:$0xff] %v399_v50  ;;  %402 = vst [vmem:[%s2318_s8 + $0x398] sm:$0xff] %v401_v51  ;;  %v405_v53 = vld [vmem:[%s2313_s7 + $0x748] sm:$0xff]  ;;  %v407_v54 = vld [vmem:[%s2313_s7 + $0x750] sm:$0xff] }
  0x51   : > { %404 = vst [vmem:[%s2318_s8 + $0x3a0] sm:$0xff] %v403_v52  ;;  %v409_v55 = vld [vmem:[%s2313_s7 + $0x758] sm:$0xff]  ;;  %406 = vst [vmem:[%s2318_s8 + $0x3a8] sm:$0xff] %v405_v53  ;;  %v411_v56 = vld [vmem:[%s2313_s7 + $0x780] sm:$0xff] }
  0x52   : > { %408 = vst [vmem:[%s2318_s8 + $0x3b0] sm:$0xff] %v407_v54  ;;  %410 = vst [vmem:[%s2318_s8 + $0x3b8] sm:$0xff] %v409_v55  ;;  %v413_v57 = vld [vmem:[%s2313_s7 + $0x788] sm:$0xff]  ;;  %v415_v58 = vld [vmem:[%s2313_s7 + $0x790] sm:$0xff] }
  0x53   : > { %412 = vst [vmem:[%s2318_s8 + $0x3c0] sm:$0xff] %v411_v56  ;;  %414 = vst [vmem:[%s2318_s8 + $0x3c8] sm:$0xff] %v413_v57  ;;  %v417_v59 = vld [vmem:[%s2313_s7 + $0x798] sm:$0xff]  ;;  %v419_v60 = vld [vmem:[%s2313_s7 + $0x7c0] sm:$0xff] }
  0x54   : > { %416 = vst [vmem:[%s2318_s8 + $0x3d0] sm:$0xff] %v415_v58  ;;  %v421_v61 = vld [vmem:[%s2313_s7 + $0x7c8] sm:$0xff]  ;;  %418 = vst [vmem:[%s2318_s8 + $0x3d8] sm:$0xff] %v417_v59  ;;  %v423_v62 = vld [vmem:[%s2313_s7 + $0x7d0] sm:$0xff] }
  0x55   : > { %420 = vst [vmem:[%s2318_s8 + $0x3e0] sm:$0xff] %v419_v60  ;;  %422 = vst [vmem:[%s2318_s8 + $0x3e8] sm:$0xff] %v421_v61  ;;  %v425_v63 = vld [vmem:[%s2313_s7 + $0x7d8] sm:$0xff] }
  0x56   : > { %424 = vst [vmem:[%s2318_s8 + $0x3f0] sm:$0xff] %v423_v62  ;;  %426 = vst [vmem:[%s2318_s8 + $0x3f8] sm:$0xff] %v425_v63 }
  0x57 PF: > { %p1814_p7 = scmp.ge.s32.totalorder %s2229_s18, 1  ;;  %p449_p8 = scmp.lt.s32.totalorder %s2229_s18, 9 }
  0x59   : > { %p450_p9 = pnand %p1814_p7, %p449_p8 }
  0x5a   : > { %s456_s9 = sand.u32 (!%p450_p9), 1, %s2205_s12   ;;  %s1816_s10 = sshll.u32 (!%p450_p9), %s2213_s14, 6 }
  0x5b   : > { %453 = sbr.rel (%p450_p9) target bundleno = 671 (0x29f), region = 51  ;;  %s1815_s11 = sshll.u32 (!%p450_p9), %s456_s9, 10 }
  0x5c   : > { %p492_p10 = scmp.lt.s32.totalorder (!%p450_p9), %s1816_s10, 127  ;;  %s1818_s21 = sshll.u32 (!%p450_p9), %s2217_s15, 5 }
  0x5d   : > { %p498_p11 = scmp.lt.s32.totalorder (!%p450_p9), %s1818_s21, 127  ;;  %s2593_s15 = scalar_lea.vmem (!%p450_p9), [#allocation3], %s1815_s11 }
  0x5e   : > { %p1822_p12 = scmp.ne.s32.totalorder (!%p450_p9), %s2213_s14, 0 }
  0x60   : > { %s2859_s10 = smov (!%p492_p10, %s1816_s10), 127  ;;  %s2861_s21 = smov (!%p498_p11, %s1818_s21), 127 }
  0x61   : > { %s1817_s22 = sshll.u32 %s2859_s10, 2  ;;  %s1819_s27 = sshll.u32 %s2861_s21, 3 }
  0x62   : > { %s2581_s26 = scalar_lea.vmem %s2843_s1, %s1817_s22  ;;  %s2586_s30 = scalar_lea.vmem %s2844_s2, %s1819_s27 }
  0x63   : > { %s2591_s5 = scalar_lea.vmem %s2845_s3, %s1819_s27  ;;  %513 = sbr.rel (%p1822_p12) target bundleno = 121 (0x79), region = 59 }
  0x68   : > { %v2231_v0 = vmov 0.0  }
  0x69   : > { %514 = vst [vmem:[#allocation2 + $0xb0] sm:$0xff] %v2231_v0  ;;  %515 = vst [vmem:[#allocation2] sm:$0xff] %v2231_v0 }
  0x6a   : > { %516 = vst [vmem:[#allocation2 + $0xd8] sm:$0xff] %v2231_v0  ;;  %517 = vst [vmem:[#allocation2 + $0x18] sm:$0xff] %v2231_v0 }
  0x6b   : > { %518 = vst [vmem:[#allocation2 + $0x50] sm:$0xff] %v2231_v0  ;;  %519 = vst [vmem:[#allocation2 + $0x68] sm:$0xff] %v2231_v0 }
  0x6c   : > { %520 = vst [vmem:[#allocation2 + $0x30] sm:$0xff] %v2231_v0  ;;  %521 = vst [vmem:[#allocation2 + $0x48] sm:$0xff] %v2231_v0 }
  0x6d   : > { %522 = vst [vmem:[#allocation2 + $0x80] sm:$0xff] %v2231_v0  ;;  %523 = vst [vmem:[#allocation2 + $0x88] sm:$0xff] %v2231_v0 }
  0x6e   : > { %524 = vst [vmem:[#allocation2 + $0xe8] sm:$0xff] %v2231_v0  ;;  %525 = vst [vmem:[#allocation2 + $0xb8] sm:$0xff] %v2231_v0 }
  0x6f   : > { %526 = vst [vmem:[#allocation2 + $0x60] sm:$0xff] %v2231_v0  ;;  %527 = vst [vmem:[#allocation2 + $0xf0] sm:$0xff] %v2231_v0 }
  0x70   : > { %528 = vst [vmem:[#allocation2 + $0x8] sm:$0xff] %v2231_v0  ;;  %529 = vst [vmem:[#allocation2 + $0x78] sm:$0xff] %v2231_v0 }
  0x71   : > { %530 = vst [vmem:[#allocation2 + $0x38] sm:$0xff] %v2231_v0  ;;  %531 = vst [vmem:[#allocation2 + $0x58] sm:$0xff] %v2231_v0 }
  0x72   : > { %532 = vst [vmem:[#allocation2 + $0x40] sm:$0xff] %v2231_v0  ;;  %533 = vst [vmem:[#allocation2 + $0xc8] sm:$0xff] %v2231_v0 }
  0x73   : > { %534 = vst [vmem:[#allocation2 + $0xe0] sm:$0xff] %v2231_v0  ;;  %535 = vst [vmem:[#allocation2 + $0x90] sm:$0xff] %v2231_v0 }
  0x74   : > { %536 = vst [vmem:[#allocation2 + $0x70] sm:$0xff] %v2231_v0  ;;  %537 = vst [vmem:[#allocation2 + $0xc0] sm:$0xff] %v2231_v0 }
  0x75   : > { %538 = vst [vmem:[#allocation2 + $0xa8] sm:$0xff] %v2231_v0  ;;  %539 = vst [vmem:[#allocation2 + $0xd0] sm:$0xff] %v2231_v0 }
  0x76   : > { %540 = vst [vmem:[#allocation2 + $0x10] sm:$0xff] %v2231_v0  ;;  %541 = vst [vmem:[#allocation2 + $0x28] sm:$0xff] %v2231_v0 }
  0x77   : > { %542 = vst [vmem:[#allocation2 + $0xa0] sm:$0xff] %v2231_v0  ;;  %543 = vst [vmem:[#allocation2 + $0xf8] sm:$0xff] %v2231_v0 }
  0x78   : > { %544 = vst [vmem:[#allocation2 + $0x20] sm:$0xff] %v2231_v0  ;;  %545 = vst [vmem:[#allocation2 + $0x98] sm:$0xff] %v2231_v0 }
  0x79 PF: > { %v2141_v1 = vld [vmem:[%s2581_s26 + $0x78] sm:$0xff]   ;;  %v2145_v5 = vld [vmem:[%s2581_s26 + $0x70] sm:$0xff]   ;;  %v2149_v9 = vld [vmem:[%s2581_s26 + $0x68] sm:$0xff]   ;;  %p1855_p13 = scmp.ne.s32.totalorder %s2213_s14, 1 }
  0x7a   : > { %v2142_v2 = vld [vmem:[%s2581_s26 + $0xf8] sm:$0xff]   ;;  %1859 = vmatprep.subr.bf16.mxu0 %v2141_v1  ;;  %v2146_v6 = vld [vmem:[%s2581_s26 + $0xf0] sm:$0xff]   ;;  %v2150_v10 = vld [vmem:[%s2581_s26 + $0xe8] sm:$0xff]  }
  0x7b   : > { %v2143_v3 = vld [vmem:[%s2581_s26 + $0x38] sm:$0xff]   ;;  %1971 = vmatprep.subr.bf16.mxu1 %v2142_v2  ;;  %v2147_v7 = vld [vmem:[%s2581_s26 + $0x30] sm:$0xff]   ;;  %v2151_v11 = vld [vmem:[%s2581_s26 + $0x28] sm:$0xff]  }
  0x7c   : > { %v2144_v4 = vld [vmem:[%s2581_s26 + $0xb8] sm:$0xff]   ;;  %1860 = vmatpush3.bf16.msra.mxu0 %v2143_v3  ;;  %v2148_v8 = vld [vmem:[%s2581_s26 + $0xb0] sm:$0xff]   ;;  %v2152_v12 = vld [vmem:[%s2581_s26 + $0xa8] sm:$0xff]  }
  0x7d   : > { %1972 = vmatpush3.bf16.msra.mxu1 %v2144_v4  ;;  %1861 = vmatprep.subr.bf16.mxu0 %v2145_v5  ;;  %v2153_v13 = vld [vmem:[%s2581_s26 + $0x60] sm:$0xff]   ;;  %v2157_v17 = vld [vmem:[%s2581_s26 + $0x58] sm:$0xff]   ;;  %v2161_v21 = vld [vmem:[%s2581_s26 + $0x50] sm:$0xff]  }
  0x7e   : > { %1973 = vmatprep.subr.bf16.mxu1 %v2146_v6  ;;  %v2154_v14 = vld [vmem:[%s2581_s26 + $0xe0] sm:$0xff]   ;;  %v2158_v18 = vld [vmem:[%s2581_s26 + $0xd8] sm:$0xff]   ;;  %v2162_v22 = vld [vmem:[%s2581_s26 + $0xd0] sm:$0xff]  }
  0x7f   : > { %v2155_v15 = vld [vmem:[%s2581_s26 + $0x20] sm:$0xff]   ;;  %v2159_v19 = vld [vmem:[%s2581_s26 + $0x18] sm:$0xff]   ;;  %v2163_v23 = vld [vmem:[%s2581_s26 + $0x10] sm:$0xff]  }
  0x80   : > { %1862 = vmatpush3.bf16.msra.mxu0 %v2147_v7  ;;  %v2156_v16 = vld [vmem:[%s2581_s26 + $0xa0] sm:$0xff]   ;;  %v2160_v20 = vld [vmem:[%s2581_s26 + $0x98] sm:$0xff]   ;;  %v2164_v24 = vld [vmem:[%s2581_s26 + $0x90] sm:$0xff]  }
  0x81   : > { %1974 = vmatpush3.bf16.msra.mxu1 %v2148_v8  ;;  %1863 = vmatprep.subr.bf16.mxu0 %v2149_v9  ;;  %v2165_v25 = vld [vmem:[%s2581_s26 + $0x48] sm:$0xff]   ;;  %v2169_v29 = vld [vmem:[%s2581_s26 + $0x40] sm:$0xff]   ;;  %v549_v35 = vld [vmem:[%s2593_s15 + $0x18] sm:$0xff] }
  0x82   : > { %1975 = vmatprep.subr.bf16.mxu1 %v2150_v10  ;;  %v2166_v26 = vld [vmem:[%s2581_s26 + $0xc8] sm:$0xff]   ;;  %v2170_v30 = vld [vmem:[%s2581_s26 + $0xc0] sm:$0xff]   ;;  %v553_v37 = vld [vmem:[%s2593_s15 + $0x38] sm:$0xff] }
  0x83   : > { %v2167_v27 = vld [vmem:[%s2581_s26 + $0x8] sm:$0xff]   ;;  %v2171_v31 = vld [vmem:[%s2581_s26] sm:$0xff]   ;;  %v677_v40 = vpack.c.bf16 %v553_v37, %v549_v35  ;;  %v548_v42 = vld [vmem:[%s2593_s15 + $0x10] sm:$0xff] }
  0x84   : > { %1864 = vmatpush3.bf16.msra.mxu0 %v2151_v11  ;;  %v2168_v28 = vld [vmem:[%s2581_s26 + $0x88] sm:$0xff]   ;;  %v2172_v32 = vld [vmem:[%s2581_s26 + $0x80] sm:$0xff]   ;;  %v552_v43 = vld [vmem:[%s2593_s15 + $0x30] sm:$0xff] }
  0x85   : > { %1976 = vmatpush3.bf16.msra.mxu1 %v2152_v12  ;;  %1865 = vmatprep.subr.bf16.mxu0 %v2153_v13  ;;  %v547_v33 = vld [vmem:[%s2593_s15 + $0x8] sm:$0xff]  ;;  %v546_v38 = vld [vmem:[%s2593_s15] sm:$0xff]  ;;  %v676_v45 = vpack.c.bf16 %v552_v43, %v548_v42  ;;  %v557_v47 = vld [vmem:[%s2593_s15 + $0x58] sm:$0xff] }
  0x86   : > { %1977 = vmatprep.subr.bf16.mxu1 %v2154_v14  ;;  %v551_v34 = vld [vmem:[%s2593_s15 + $0x28] sm:$0xff]  ;;  %v550_v39 = vld [vmem:[%s2593_s15 + $0x20] sm:$0xff]  ;;  %v561_v48 = vld [vmem:[%s2593_s15 + $0x78] sm:$0xff]  ;;  %1219 = vmatprep.mubr.bf16.mxu1 %v677_v40 }
  0x87   : > { %v675_v36 = vpack.c.bf16 %v551_v34, %v547_v33  ;;  %v674_v41 = vpack.c.bf16 %v550_v39, %v546_v38  ;;  %v555_v44 = vld [vmem:[%s2593_s15 + $0x48] sm:$0xff]  ;;  %v681_v50 = vpack.c.bf16 %v561_v48, %v557_v47  ;;  %v554_v51 = vld [vmem:[%s2593_s15 + $0x40] sm:$0xff]  ;;  %v556_v53 = vld [vmem:[%s2593_s15 + $0x50] sm:$0xff] }
  0x88   : > { %1866 = vmatpush3.bf16.msra.mxu0 %v2155_v15  ;;  %v559_v46 = vld [vmem:[%s2593_s15 + $0x68] sm:$0xff]  ;;  %v558_v52 = vld [vmem:[%s2593_s15 + $0x60] sm:$0xff]  ;;  %v560_v54 = vld [vmem:[%s2593_s15 + $0x70] sm:$0xff] }
  0x89   : > { %1978 = vmatpush3.bf16.msra.mxu1 %v2156_v16  ;;  %1867 = vmatprep.subr.bf16.mxu0 %v2157_v17  ;;  %v679_v49 = vpack.c.bf16 %v559_v46, %v555_v44  ;;  %v563_v55 = vld [vmem:[%s2593_s15 + $0x88] sm:$0xff]  ;;  %v565_v57 = vld [vmem:[%s2593_s15 + $0x98] sm:$0xff]  ;;  %v678_v59 = vpack.c.bf16 %v558_v52, %v554_v51  ;;  %v680_v60 = vpack.c.bf16 %v560_v54, %v556_v53  ;;  %v562_v63 = vld [vmem:[%s2593_s15 + $0x80] sm:$0xff] }
  0x8a   : > { %1979 = vmatprep.subr.bf16.mxu1 %v2158_v18  ;;  %1058 = vmatprep.mubr.bf16.mxu0 %v675_v36  ;;  %v567_v56 = vld [vmem:[%s2593_s15 + $0xa8] sm:$0xff]  ;;  %v569_v58 = vld [vmem:[%s2593_s15 + $0xb8] sm:$0xff]  ;;  %v566_v0 = vld [vmem:[%s2593_s15 + $0xa0] sm:$0xff] }
  0x8b   : > { %v683_v61 = vpack.c.bf16 %v567_v56, %v563_v55  ;;  %v685_v62 = vpack.c.bf16 %v569_v58, %v565_v57  ;;  %v564_v1 = vld [vmem:[%s2593_s15 + $0x90] sm:$0xff]  ;;  %v571_v3 = vld [vmem:[%s2593_s15 + $0xc8] sm:$0xff]  ;;  %v573_v5 = vld [vmem:[%s2593_s15 + $0xd8] sm:$0xff]  ;;  %v682_v7 = vpack.c.bf16 %v566_v0, %v562_v63 }
  0x8c   : > { %1868 = vmatpush3.bf16.msra.mxu0 %v2159_v19  ;;  %v568_v2 = vld [vmem:[%s2593_s15 + $0xb0] sm:$0xff]  ;;  %v575_v4 = vld [vmem:[%s2593_s15 + $0xe8] sm:$0xff]  ;;  %v577_v6 = vld [vmem:[%s2593_s15 + $0xf8] sm:$0xff] }
  0x8d   : > { %1980 = vmatpush3.bf16.msra.mxu1 %v2160_v20  ;;  %1869 = vmatprep.subr.bf16.mxu0 %v2161_v21  ;;  %v684_v8 = vpack.c.bf16 %v568_v2, %v564_v1  ;;  %v687_v9 = vpack.c.bf16 %v575_v4, %v571_v3  ;;  %v689_v10 = vpack.c.bf16 %v577_v6, %v573_v5  ;;  %v570_v11 = vld [vmem:[%s2593_s15 + $0xc0] sm:$0xff]  ;;  %v572_v13 = vld [vmem:[%s2593_s15 + $0xd0] sm:$0xff]  ;;  %v579_v15 = vld [vmem:[%s2593_s15 + $0x108] sm:$0xff] }
  0x8e   : > { %1981 = vmatprep.subr.bf16.mxu1 %v2162_v22  ;;  %v574_v12 = vld [vmem:[%s2593_s15 + $0xe0] sm:$0xff]  ;;  %v576_v14 = vld [vmem:[%s2593_s15 + $0xf0] sm:$0xff]  ;;  %v583_v16 = vld [vmem:[%s2593_s15 + $0x128] sm:$0xff] }
  0x8f   : > { %v581_v17 = vld [vmem:[%s2593_s15 + $0x118] sm:$0xff]  ;;  %v686_v19 = vpack.c.bf16 %v574_v12, %v570_v11  ;;  %v688_v20 = vpack.c.bf16 %v576_v14, %v572_v13  ;;  %v691_v21 = vpack.c.bf16 %v583_v16, %v579_v15  ;;  %v586_v35 = vld [vmem:[%s2593_s15 + $0x140] sm:$0xff]  ;;  %v588_v37 = vld [vmem:[%s2593_s15 + $0x150] sm:$0xff] }
  0x90   : > { %1870 = vmatpush3.bf16.msra.mxu0 %v2163_v23  ;;  %v585_v18 = vld [vmem:[%s2593_s15 + $0x138] sm:$0xff]  ;;  %v578_v23 = vld [vmem:[%s2593_s15 + $0x100] sm:$0xff]  ;;  %v592_v38 = vld [vmem:[%s2593_s15 + $0x170] sm:$0xff] }
  0x91   : > { %1982 = vmatpush3.bf16.msra.mxu1 %v2164_v24  ;;  %1871 = vmatprep.subr.bf16.mxu0 %v2165_v25  ;;  %v693_v22 = vpack.c.bf16 %v585_v18, %v581_v17  ;;  %v582_v24 = vld [vmem:[%s2593_s15 + $0x120] sm:$0xff]  ;;  %v580_v25 = vld [vmem:[%s2593_s15 + $0x110] sm:$0xff]  ;;  %v595_v39 = vld [vmem:[%s2593_s15 + $0x188] sm:$0xff]  ;;  %v696_v44 = vpack.c.bf16 %v592_v38, %v588_v37 }
  0x92   : > { %1983 = vmatprep.subr.bf16.mxu1 %v2166_v26  ;;  %v584_v26 = vld [vmem:[%s2593_s15 + $0x130] sm:$0xff]  ;;  %v590_v36 = vld [vmem:[%s2593_s15 + $0x160] sm:$0xff]  ;;  %v599_v40 = vld [vmem:[%s2593_s15 + $0x1a8] sm:$0xff] }
  0x93   : > { %v601_v42 = vld [vmem:[%s2593_s15 + $0x1b8] sm:$0xff]  ;;  %v694_v43 = vpack.c.bf16 %v590_v36, %v586_v35  ;;  %v594_v47 = vld [vmem:[%s2593_s15 + $0x180] sm:$0xff]  ;;  %v603_v51 = vld [vmem:[%s2593_s15 + $0x1c8] sm:$0xff] }
  0x94   : > { %1872 = vmatpush3.bf16.msra.mxu0 %v2167_v27  ;;  %v587_v27 = vld [vmem:[%s2593_s15 + $0x148] sm:$0xff]  ;;  %v598_v48 = vld [vmem:[%s2593_s15 + $0x1a0] sm:$0xff]  ;;  %v605_v53 = vld [vmem:[%s2593_s15 + $0x1d8] sm:$0xff] }
  0x95   : > { %1984 = vmatpush3.bf16.msra.mxu1 %v2168_v28  ;;  %1873 = vmatprep.subr.bf16.mxu0 %v2169_v29  ;;  %v591_v28 = vld [vmem:[%s2593_s15 + $0x168] sm:$0xff]  ;;  %v589_v29 = vld [vmem:[%s2593_s15 + $0x158] sm:$0xff]  ;;  %v698_v55 = vpack.c.bf16 %v598_v48, %v594_v47 }
  0x96   : > { %1985 = vmatprep.subr.bf16.mxu1 %v2170_v30  ;;  %v593_v30 = vld [vmem:[%s2593_s15 + $0x178] sm:$0xff]  ;;  %v695_v33 = vpack.c.bf16 %v591_v28, %v587_v27  ;;  %v607_v52 = vld [vmem:[%s2593_s15 + $0x1e8] sm:$0xff] }
  0x97   : > { %v697_v34 = vpack.c.bf16 %v593_v30, %v589_v29  ;;  %v609_v54 = vld [vmem:[%s2593_s15 + $0x1f8] sm:$0xff]  ;;  %v703_v57 = vpack.c.bf16 %v607_v52, %v603_v51  ;;  %v611_v63 = vld [vmem:[%s2593_s15 + $0x208] sm:$0xff] }
  0x98   : > { %1874 = vmatpush3.bf16.msra.mxu0 %v2171_v31  ;;  %v690_v31 = vpack.c.bf16 %v582_v24, %v578_v23  ;;  %v705_v58 = vpack.c.bf16 %v609_v54, %v605_v53  ;;  %v615_v0 = vld [vmem:[%s2593_s15 + $0x228] sm:$0xff]  ;;  %v613_v1 = vld [vmem:[%s2593_s15 + $0x218] sm:$0xff] }
  0x99   : > { %1986 = vmatpush3.bf16.msra.mxu1 %v2172_v32  ;;  %v692_v32 = vpack.c.bf16 %v584_v26, %v580_v25  ;;  %v617_v2 = vld [vmem:[%s2593_s15 + $0x238] sm:$0xff]  ;;  %v707_v5 = vpack.c.bf16 %v615_v0, %v611_v63  ;;  %v619_v11 = vld [vmem:[%s2593_s15 + $0x248] sm:$0xff] }
  0x9a   : > { %v709_v6 = vpack.c.bf16 %v617_v2, %v613_v1  ;;  %v623_v12 = vld [vmem:[%s2593_s15 + $0x268] sm:$0xff]  ;;  %v621_v13 = vld [vmem:[%s2593_s15 + $0x258] sm:$0xff] }
  0x9b   : > { %1059 = vmatmul.mubr.bf16.vlgmr.msra.gmra.mxu0 %v674_v41  ;;  %v597_v41 = vld [vmem:[%s2593_s15 + $0x198] sm:$0xff]  ;;  %v711_v17 = vpack.c.bf16 %v623_v12, %v619_v11  ;;  %v627_v23 = vld [vmem:[%s2593_s15 + $0x288] sm:$0xff] }
  0x9c   : > { %1220 = vmatmul.mubr.bf16.vlgmr.msra.gmra.mxu1 %v676_v45  ;;  %1066 = vmatprep.mubr.bf16.mxu0 %v679_v49  ;;  %v699_v45 = vpack.c.bf16 %v599_v40, %v595_v39  ;;  %v701_v46 = vpack.c.bf16 %v601_v42, %v597_v41  ;;  %v596_v49 = vld [vmem:[%s2593_s15 + $0x190] sm:$0xff]  ;;  %v625_v14 = vld [vmem:[%s2593_s15 + $0x278] sm:$0xff]  ;;  %v631_v24 = vld [vmem:[%s2593_s15 + $0x2a8] sm:$0xff] }
  0x9d   : > { %1227 = vmatprep.mubr.bf16.mxu1 %v681_v50  ;;  %v600_v50 = vld [vmem:[%s2593_s15 + $0x1b0] sm:$0xff]  ;;  %v713_v18 = vpack.c.bf16 %v625_v14, %v621_v13  ;;  %v629_v25 = vld [vmem:[%s2593_s15 + $0x298] sm:$0xff]  ;;  %v715_v29 = vpack.c.bf16 %v631_v24, %v627_v23  ;;  %v635_v35 = vld [vmem:[%s2593_s15 + $0x2c8] sm:$0xff] }
  0x9e   : > { %v700_v56 = vpack.c.bf16 %v600_v50, %v596_v49  ;;  %v633_v26 = vld [vmem:[%s2593_s15 + $0x2b8] sm:$0xff]  ;;  %v639_v36 = vld [vmem:[%s2593_s15 + $0x2e8] sm:$0xff] }
  0x9f   : > { %v717_v30 = vpack.c.bf16 %v633_v26, %v629_v25  ;;  %v637_v37 = vld [vmem:[%s2593_s15 + $0x2d8] sm:$0xff]  ;;  %v719_v41 = vpack.c.bf16 %v639_v36, %v635_v35  ;;  %v643_v47 = vld [vmem:[%s2593_s15 + $0x308] sm:$0xff] }
  0xa0   : > { %v641_v38 = vld [vmem:[%s2593_s15 + $0x2f8] sm:$0xff]  ;;  %v647_v48 = vld [vmem:[%s2593_s15 + $0x328] sm:$0xff] }
  0xa1   : > { %v721_v42 = vpack.c.bf16 %v641_v38, %v637_v37  ;;  %v645_v49 = vld [vmem:[%s2593_s15 + $0x318] sm:$0xff]  ;;  %v723_v53 = vpack.c.bf16 %v647_v48, %v643_v47 }
  0xa2   : > { %v649_v50 = vld [vmem:[%s2593_s15 + $0x338] sm:$0xff] }
  0xa3   : > { %1067 = vmatmul.mubr.bf16.gmra.mxu0 %v678_v59  ;;  %v602_v59 = vld [vmem:[%s2593_s15 + $0x1c0] sm:$0xff]  ;;  %v725_v54 = vpack.c.bf16 %v649_v50, %v645_v49 }
  0xa4   : > { %1228 = vmatmul.mubr.bf16.gmra.mxu1 %v680_v60  ;;  %1074 = vmatprep.mubr.bf16.mxu0 %v683_v61  ;;  %v606_v60 = vld [vmem:[%s2593_s15 + $0x1e0] sm:$0xff]  ;;  %v604_v61 = vld [vmem:[%s2593_s15 + $0x1d0] sm:$0xff] }
  0xa5   : > { %1235 = vmatprep.mubr.bf16.mxu1 %v685_v62  ;;  %v608_v62 = vld [vmem:[%s2593_s15 + $0x1f0] sm:$0xff]  ;;  %v702_v3 = vpack.c.bf16 %v606_v60, %v602_v59  ;;  %v651_v59 = vld [vmem:[%s2593_s15 + $0x348] sm:$0xff]  ;;  %v739_v49 = vld [vmem:[#allocation2] sm:$0xff] }
  0xa6   : > { %v704_v4 = vpack.c.bf16 %v608_v62, %v604_v61  ;;  %v655_v60 = vld [vmem:[%s2593_s15 + $0x368] sm:$0xff]  ;;  %v653_v61 = vld [vmem:[%s2593_s15 + $0x358] sm:$0xff] }
  0xa7   : > { %v657_v62 = vld [vmem:[%s2593_s15 + $0x378] sm:$0xff]  ;;  %v727_v1 = vpack.c.bf16 %v655_v60, %v651_v59 }
  0xa8   : > { %v729_v2 = vpack.c.bf16 %v657_v62, %v653_v61 }
  0xab   : > { %1075 = vmatmul.mubr.bf16.gmra.mxu0 %v682_v7  ;;  %v610_v7 = vld [vmem:[%s2593_s15 + $0x200] sm:$0xff] }
  0xac   : > { %1236 = vmatmul.mubr.bf16.gmra.mxu1 %v684_v8  ;;  %1082 = vmatprep.mubr.bf16.mxu0 %v687_v9  ;;  %v614_v8 = vld [vmem:[%s2593_s15 + $0x220] sm:$0xff]  ;;  %v612_v9 = vld [vmem:[%s2593_s15 + $0x210] sm:$0xff] }
  0xad   : > { %1243 = vmatprep.mubr.bf16.mxu1 %v689_v10  ;;  %v616_v10 = vld [vmem:[%s2593_s15 + $0x230] sm:$0xff]  ;;  %v706_v15 = vpack.c.bf16 %v614_v8, %v610_v7  ;;  %v659_v7 = vld [vmem:[%s2593_s15 + $0x388] sm:$0xff] }
  0xae   : > { %v708_v16 = vpack.c.bf16 %v616_v10, %v612_v9  ;;  %v663_v8 = vld [vmem:[%s2593_s15 + $0x3a8] sm:$0xff]  ;;  %v661_v9 = vld [vmem:[%s2593_s15 + $0x398] sm:$0xff] }
  0xaf   : > { %v665_v10 = vld [vmem:[%s2593_s15 + $0x3b8] sm:$0xff]  ;;  %v731_v13 = vpack.c.bf16 %v663_v8, %v659_v7 }
  0xb0   : > { %v733_v14 = vpack.c.bf16 %v665_v10, %v661_v9 }
  0xb3   : > { %1083 = vmatmul.mubr.bf16.gmra.mxu0 %v686_v19  ;;  %v618_v19 = vld [vmem:[%s2593_s15 + $0x240] sm:$0xff] }
  0xb4   : > { %1244 = vmatmul.mubr.bf16.gmra.mxu1 %v688_v20  ;;  %1090 = vmatprep.mubr.bf16.mxu0 %v691_v21  ;;  %v622_v20 = vld [vmem:[%s2593_s15 + $0x260] sm:$0xff]  ;;  %v620_v21 = vld [vmem:[%s2593_s15 + $0x250] sm:$0xff] }
  0xb5   : > { %1251 = vmatprep.mubr.bf16.mxu1 %v693_v22  ;;  %v624_v22 = vld [vmem:[%s2593_s15 + $0x270] sm:$0xff]  ;;  %v710_v27 = vpack.c.bf16 %v622_v20, %v618_v19  ;;  %v667_v19 = vld [vmem:[%s2593_s15 + $0x3c8] sm:$0xff] }
  0xb6   : > { %v712_v28 = vpack.c.bf16 %v624_v22, %v620_v21  ;;  %v671_v20 = vld [vmem:[%s2593_s15 + $0x3e8] sm:$0xff]  ;;  %v669_v21 = vld [vmem:[%s2593_s15 + $0x3d8] sm:$0xff] }
  0xb7   : > { %v673_v22 = vld [vmem:[%s2593_s15 + $0x3f8] sm:$0xff]  ;;  %v735_v25 = vpack.c.bf16 %v671_v20, %v667_v19 }
  0xb8   : > { %v737_v26 = vpack.c.bf16 %v673_v22, %v669_v21  ;;  %v743_v21 = vld [vmem:[#allocation2 + $0x68] sm:$0xff] }
  0xbb   : > { %1091 = vmatmul.mubr.bf16.gmra.mxu0 %v690_v31  ;;  %v626_v31 = vld [vmem:[%s2593_s15 + $0x280] sm:$0xff] }
  0xbc   : > { %1252 = vmatmul.mubr.bf16.gmra.mxu1 %v692_v32  ;;  %1098 = vmatprep.mubr.bf16.mxu0 %v695_v33  ;;  %v630_v32 = vld [vmem:[%s2593_s15 + $0x2a0] sm:$0xff]  ;;  %v628_v33 = vld [vmem:[%s2593_s15 + $0x290] sm:$0xff] }
  0xbd   : > { %1259 = vmatprep.mubr.bf16.mxu1 %v697_v34  ;;  %v632_v34 = vld [vmem:[%s2593_s15 + $0x2b0] sm:$0xff]  ;;  %v714_v39 = vpack.c.bf16 %v630_v32, %v626_v31 }
  0xbe   : > { %v716_v40 = vpack.c.bf16 %v632_v34, %v628_v33 }
  0xc3   : > { %1099 = vmatmul.mubr.bf16.gmra.mxu0 %v694_v43  ;;  %v634_v43 = vld [vmem:[%s2593_s15 + $0x2c0] sm:$0xff] }
  0xc4   : > { %1260 = vmatmul.mubr.bf16.gmra.mxu1 %v696_v44  ;;  %1106 = vmatprep.mubr.bf16.mxu0 %v699_v45  ;;  %v638_v44 = vld [vmem:[%s2593_s15 + $0x2e0] sm:$0xff]  ;;  %v636_v45 = vld [vmem:[%s2593_s15 + $0x2d0] sm:$0xff] }
  0xc5   : > { %1267 = vmatprep.mubr.bf16.mxu1 %v701_v46  ;;  %v640_v46 = vld [vmem:[%s2593_s15 + $0x2f0] sm:$0xff]  ;;  %v718_v51 = vpack.c.bf16 %v638_v44, %v634_v43 }
  0xc6   : > { %v720_v52 = vpack.c.bf16 %v640_v46, %v636_v45 }
  0xcb   : > { %1107 = vmatmul.mubr.bf16.gmra.mxu0 %v698_v55  ;;  %v642_v55 = vld [vmem:[%s2593_s15 + $0x300] sm:$0xff] }
  0xcc   : > { %1268 = vmatmul.mubr.bf16.gmra.mxu1 %v700_v56  ;;  %1114 = vmatprep.mubr.bf16.mxu0 %v703_v57  ;;  %v646_v56 = vld [vmem:[%s2593_s15 + $0x320] sm:$0xff]  ;;  %v644_v57 = vld [vmem:[%s2593_s15 + $0x310] sm:$0xff] }
  0xcd   : > { %1275 = vmatprep.mubr.bf16.mxu1 %v705_v58  ;;  %v648_v58 = vld [vmem:[%s2593_s15 + $0x330] sm:$0xff]  ;;  %v722_v63 = vpack.c.bf16 %v646_v56, %v642_v55 }
  0xce   : > { %v724_v0 = vpack.c.bf16 %v648_v58, %v644_v57  ;;  %v740_v58 = vld [vmem:[#allocation2 + $0xd8] sm:$0xff] }
  0xd3   : > { %1115 = vmatmul.mubr.bf16.gmra.mxu0 %v702_v3  ;;  %v650_v3 = vld [vmem:[%s2593_s15 + $0x340] sm:$0xff] }
  0xd4   : > { %1276 = vmatmul.mubr.bf16.gmra.mxu1 %v704_v4  ;;  %1122 = vmatprep.mubr.bf16.mxu0 %v707_v5  ;;  %v654_v4 = vld [vmem:[%s2593_s15 + $0x360] sm:$0xff]  ;;  %v652_v5 = vld [vmem:[%s2593_s15 + $0x350] sm:$0xff] }
  0xd5   : > { %1283 = vmatprep.mubr.bf16.mxu1 %v709_v6  ;;  %v656_v6 = vld [vmem:[%s2593_s15 + $0x370] sm:$0xff]  ;;  %v726_v11 = vpack.c.bf16 %v654_v4, %v650_v3  ;;  %v741_v3 = vld [vmem:[#allocation2 + $0x18] sm:$0xff] }
  0xd6   : > { %v728_v12 = vpack.c.bf16 %v656_v6, %v652_v5 }
  0xdb   : > { %1123 = vmatmul.mubr.bf16.gmra.mxu0 %v706_v15  ;;  %v658_v15 = vld [vmem:[%s2593_s15 + $0x380] sm:$0xff] }
  0xdc   : > { %1284 = vmatmul.mubr.bf16.gmra.mxu1 %v708_v16  ;;  %1130 = vmatprep.mubr.bf16.mxu0 %v711_v17  ;;  %v662_v16 = vld [vmem:[%s2593_s15 + $0x3a0] sm:$0xff]  ;;  %v660_v17 = vld [vmem:[%s2593_s15 + $0x390] sm:$0xff] }
  0xdd   : > { %1291 = vmatprep.mubr.bf16.mxu1 %v713_v18  ;;  %v664_v18 = vld [vmem:[%s2593_s15 + $0x3b0] sm:$0xff]  ;;  %v730_v23 = vpack.c.bf16 %v662_v16, %v658_v15 }
  0xde   : > { %v732_v24 = vpack.c.bf16 %v664_v18, %v660_v17 }
  0xe3   : > { %1131 = vmatmul.mubr.bf16.gmra.mxu0 %v710_v27  ;;  %v666_v27 = vld [vmem:[%s2593_s15 + $0x3c0] sm:$0xff] }
  0xe4   : > { %1292 = vmatmul.mubr.bf16.gmra.mxu1 %v712_v28  ;;  %1138 = vmatprep.mubr.bf16.mxu0 %v715_v29  ;;  %v670_v28 = vld [vmem:[%s2593_s15 + $0x3e0] sm:$0xff]  ;;  %v668_v29 = vld [vmem:[%s2593_s15 + $0x3d0] sm:$0xff] }
  0xe5   : > { %1299 = vmatprep.mubr.bf16.mxu1 %v717_v30  ;;  %v672_v30 = vld [vmem:[%s2593_s15 + $0x3f0] sm:$0xff]  ;;  %v734_v31 = vpack.c.bf16 %v670_v28, %v666_v27 }
  0xe6   : > { %v736_v32 = vpack.c.bf16 %v672_v30, %v668_v29  ;;  %v744_v30 = vld [vmem:[#allocation2 + $0x30] sm:$0xff] }
  0xeb   : > { %1139 = vmatmul.mubr.bf16.gmra.mxu0 %v714_v39 }
  0xec   : > { %1300 = vmatmul.mubr.bf16.gmra.mxu1 %v716_v40  ;;  %1146 = vmatprep.mubr.bf16.mxu0 %v719_v41  ;;  %v738_v40 = vld [vmem:[#allocation2 + $0xb0] sm:$0xff] }
  0xed   : > { %1307 = vmatprep.mubr.bf16.mxu1 %v721_v42 }
  0xf3   : > { %1147 = vmatmul.mubr.bf16.gmra.mxu0 %v718_v51 }
  0xf4   : > { %1308 = vmatmul.mubr.bf16.gmra.mxu1 %v720_v52  ;;  %1154 = vmatprep.mubr.bf16.mxu0 %v723_v53 }
  0xf5   : > { %1315 = vmatprep.mubr.bf16.mxu1 %v725_v54 }
  0xfb   : > { %1155 = vmatmul.mubr.bf16.gmra.mxu0 %v722_v63 }
  0xfc   : > { %1316 = vmatmul.mubr.bf16.gmra.mxu1 %v724_v0  ;;  %1162 = vmatprep.mubr.bf16.mxu0 %v727_v1 }
  0xfd   : > { %1323 = vmatprep.mubr.bf16.mxu1 %v729_v2 }
 0x103   : > { %1163 = vmatmul.mubr.bf16.gmra.mxu0 %v726_v11 }
 0x104   : > { %1324 = vmatmul.mubr.bf16.gmra.mxu1 %v728_v12  ;;  %1170 = vmatprep.mubr.bf16.mxu0 %v731_v13  ;;  %v742_v12 = vld [vmem:[#allocation2 + $0x50] sm:$0xff] }
 0x105   : > { %1331 = vmatprep.mubr.bf16.mxu1 %v733_v14 }
 0x10b   : > { %1171 = vmatmul.mubr.bf16.gmra.mxu0 %v730_v23 }
 0x10c   : > { %1332 = vmatmul.mubr.bf16.gmra.mxu1 %v732_v24  ;;  %1178 = vmatprep.mubr.bf16.mxu0 %v735_v25 }
 0x10d   : > { %1339 = vmatprep.mubr.bf16.mxu1 %v737_v26 }
 0x113   : > { %1179 = vmatmul.mubr.bf16.gmra.mxu0 %v734_v31 }
 0x114   : > { %1340 = vmatmul.mubr.bf16.gmra.mxu1 %v736_v32 }
 0x15b   : > { %v1875_v33 = vpop.f32.mrf.mxu0 }
 0x15c   : > { %v1987_v34 = vpop.f32.mrf.mxu1 }
 0x15d   : > { %v1876_v35 = vpop.f32.mrf.mxu0 }
 0x15e   : > { %v1877_v36 = vadd.f32 %v1876_v35, %v1875_v33  ;;  %v1988_v37 = vpop.f32.mrf.mxu1 }
 0x15f   : > { %v1989_v38 = vadd.f32 %v1988_v37, %v1987_v34  ;;  %v1878_v39 = vpop.f32.mrf.mxu0 }
 0x160   : > { %v1990_v41 = vpop.f32.mrf.mxu1 }
 0x161   : > { %v1222_v42 = vadd.f32 %v1989_v38, %v1877_v36  ;;  %v1879_v43 = vpop.f32.mrf.mxu0 }
 0x162   : > { %v1880_v44 = vadd.f32 %v1879_v43, %v1878_v39  ;;  %v1991_v45 = vpop.f32.mrf.mxu1  ;;  %v745_v39 = vld [vmem:[#allocation2 + $0x48] sm:$0xff] }
 0x163   : > { %v1348_v46 = vadd.f32 %v1222_v42, %v738_v40  ;;  %v1992_v47 = vadd.f32 %v1991_v45, %v1990_v41  ;;  %v1881_v48 = vpop.f32.mrf.mxu0 }
 0x164   : > { %v1993_v50 = vpop.f32.mrf.mxu1 }
 0x165   : > { %1380 = vst [vmem:[#allocation2 + $0xb0] sm:$0xff] %v1348_v46  ;;  %v1225_v51 = vadd.f32 %v1992_v47, %v1880_v44  ;;  %v1882_v52 = vpop.f32.mrf.mxu0 }
 0x166   : > { %v1883_v53 = vadd.f32 %v1882_v52, %v1881_v48  ;;  %v1994_v54 = vpop.f32.mrf.mxu1  ;;  %v746_v48 = vld [vmem:[#allocation2 + $0x80] sm:$0xff] }
 0x167   : > { %v1349_v55 = vadd.f32 %v1225_v51, %v739_v49  ;;  %v1995_v56 = vadd.f32 %v1994_v54, %v1993_v50  ;;  %v1884_v57 = vpop.f32.mrf.mxu0 }
 0x168   : > { %v1996_v59 = vpop.f32.mrf.mxu1 }
 0x169   : > { %1381 = vst [vmem:[#allocation2] sm:$0xff] %v1349_v55  ;;  %v1230_v60 = vadd.f32 %v1995_v56, %v1883_v53  ;;  %v1885_v61 = vpop.f32.mrf.mxu0 }
 0x16a   : > { %v1886_v62 = vadd.f32 %v1885_v61, %v1884_v57  ;;  %v1997_v63 = vpop.f32.mrf.mxu1  ;;  %v747_v57 = vld [vmem:[#allocation2 + $0x88] sm:$0xff] }
 0x16b   : > { %v1350_v0 = vadd.f32 %v1230_v60, %v740_v58  ;;  %v1998_v1 = vadd.f32 %v1997_v63, %v1996_v59  ;;  %v1887_v2 = vpop.f32.mrf.mxu0 }
 0x16c   : > { %v1999_v4 = vpop.f32.mrf.mxu1 }
 0x16d   : > { %1382 = vst [vmem:[#allocation2 + $0xd8] sm:$0xff] %v1350_v0  ;;  %v1233_v5 = vadd.f32 %v1998_v1, %v1886_v62  ;;  %v1888_v6 = vpop.f32.mrf.mxu0 }
 0x16e   : > { %v1889_v7 = vadd.f32 %v1888_v6, %v1887_v2  ;;  %v2000_v8 = vpop.f32.mrf.mxu1  ;;  %v748_v2 = vld [vmem:[#allocation2 + $0xe8] sm:$0xff] }
 0x16f   : > { %v1351_v9 = vadd.f32 %v1233_v5, %v741_v3  ;;  %v2001_v10 = vadd.f32 %v2000_v8, %v1999_v4  ;;  %v1890_v11 = vpop.f32.mrf.mxu0 }
 0x170   : > { %v2002_v13 = vpop.f32.mrf.mxu1 }
 0x171   : > { %1383 = vst [vmem:[#allocation2 + $0x18] sm:$0xff] %v1351_v9  ;;  %v1238_v14 = vadd.f32 %v2001_v10, %v1889_v7  ;;  %v1891_v15 = vpop.f32.mrf.mxu0 }
 0x172   : > { %v1892_v16 = vadd.f32 %v1891_v15, %v1890_v11  ;;  %v2003_v17 = vpop.f32.mrf.mxu1  ;;  %v749_v11 = vld [vmem:[#allocation2 + $0xb8] sm:$0xff] }
 0x173   : > { %v1352_v18 = vadd.f32 %v1238_v14, %v742_v12  ;;  %v2004_v19 = vadd.f32 %v2003_v17, %v2002_v13  ;;  %v1893_v20 = vpop.f32.mrf.mxu0 }
 0x174   : > { %v2005_v22 = vpop.f32.mrf.mxu1 }
 0x175   : > { %1384 = vst [vmem:[#allocation2 + $0x50] sm:$0xff] %v1352_v18  ;;  %v1241_v23 = vadd.f32 %v2004_v19, %v1892_v16  ;;  %v1894_v24 = vpop.f32.mrf.mxu0 }
 0x176   : > { %v1895_v25 = vadd.f32 %v1894_v24, %v1893_v20  ;;  %v2006_v26 = vpop.f32.mrf.mxu1  ;;  %v750_v20 = vld [vmem:[#allocation2 + $0x60] sm:$0xff] }
 0x177   : > { %v1353_v27 = vadd.f32 %v1241_v23, %v743_v21  ;;  %v2007_v28 = vadd.f32 %v2006_v26, %v2005_v22  ;;  %v1896_v29 = vpop.f32.mrf.mxu0 }
 0x178   : > { %v2008_v31 = vpop.f32.mrf.mxu1 }
 0x179   : > { %1385 = vst [vmem:[#allocation2 + $0x68] sm:$0xff] %v1353_v27  ;;  %v1246_v32 = vadd.f32 %v2007_v28, %v1895_v25  ;;  %v1897_v33 = vpop.f32.mrf.mxu0 }
 0x17a   : > { %v1898_v34 = vadd.f32 %v1897_v33, %v1896_v29  ;;  %v2009_v35 = vpop.f32.mrf.mxu1  ;;  %v751_v29 = vld [vmem:[#allocation2 + $0xf0] sm:$0xff] }
 0x17b   : > { %v1354_v36 = vadd.f32 %v1246_v32, %v744_v30  ;;  %v2010_v37 = vadd.f32 %v2009_v35, %v2008_v31  ;;  %v1899_v38 = vpop.f32.mrf.mxu0 }
 0x17c   : > { %v2011_v40 = vpop.f32.mrf.mxu1 }
 0x17d   : > { %1386 = vst [vmem:[#allocation2 + $0x30] sm:$0xff] %v1354_v36  ;;  %v1249_v41 = vadd.f32 %v2010_v37, %v1898_v34  ;;  %v1900_v42 = vpop.f32.mrf.mxu0 }
 0x17e   : > { %v1901_v43 = vadd.f32 %v1900_v42, %v1899_v38  ;;  %v2012_v44 = vpop.f32.mrf.mxu1  ;;  %v752_v38 = vld [vmem:[#allocation2 + $0x8] sm:$0xff] }
 0x17f   : > { %v1355_v45 = vadd.f32 %v1249_v41, %v745_v39  ;;  %v2013_v46 = vadd.f32 %v2012_v44, %v2011_v40  ;;  %v1902_v47 = vpop.f32.mrf.mxu0 }
 0x180   : > { %v2014_v49 = vpop.f32.mrf.mxu1 }
 0x181   : > { %1387 = vst [vmem:[#allocation2 + $0x48] sm:$0xff] %v1355_v45  ;;  %v1254_v50 = vadd.f32 %v2013_v46, %v1901_v43  ;;  %v1903_v51 = vpop.f32.mrf.mxu0 }
 0x182   : > { %v1904_v52 = vadd.f32 %v1903_v51, %v1902_v47  ;;  %v2015_v53 = vpop.f32.mrf.mxu1  ;;  %v753_v47 = vld [vmem:[#allocation2 + $0x78] sm:$0xff] }
 0x183   : > { %v1356_v54 = vadd.f32 %v1254_v50, %v746_v48  ;;  %v2016_v55 = vadd.f32 %v2015_v53, %v2014_v49  ;;  %v1905_v56 = vpop.f32.mrf.mxu0 }
 0x184   : > { %v2017_v58 = vpop.f32.mrf.mxu1 }
 0x185   : > { %1388 = vst [vmem:[#allocation2 + $0x80] sm:$0xff] %v1356_v54  ;;  %v1257_v59 = vadd.f32 %v2016_v55, %v1904_v52  ;;  %v1906_v60 = vpop.f32.mrf.mxu0 }
 0x186   : > { %v1907_v61 = vadd.f32 %v1906_v60, %v1905_v56  ;;  %v2018_v62 = vpop.f32.mrf.mxu1  ;;  %v754_v56 = vld [vmem:[#allocation2 + $0x38] sm:$0xff] }
 0x187   : > { %v1357_v63 = vadd.f32 %v1257_v59, %v747_v57  ;;  %v2019_v0 = vadd.f32 %v2018_v62, %v2017_v58  ;;  %v1908_v1 = vpop.f32.mrf.mxu0 }
 0x188   : > { %v2020_v3 = vpop.f32.mrf.mxu1 }
 0x189   : > { %1389 = vst [vmem:[#allocation2 + $0x88] sm:$0xff] %v1357_v63  ;;  %v1262_v4 = vadd.f32 %v2019_v0, %v1907_v61  ;;  %v1909_v5 = vpop.f32.mrf.mxu0 }
 0x18a   : > { %v1910_v6 = vadd.f32 %v1909_v5, %v1908_v1  ;;  %v2021_v7 = vpop.f32.mrf.mxu1  ;;  %v755_v1 = vld [vmem:[#allocation2 + $0x58] sm:$0xff] }
 0x18b   : > { %v1358_v8 = vadd.f32 %v1262_v4, %v748_v2  ;;  %v2022_v9 = vadd.f32 %v2021_v7, %v2020_v3  ;;  %v1911_v10 = vpop.f32.mrf.mxu0 }
 0x18c   : > { %v2023_v12 = vpop.f32.mrf.mxu1 }
 0x18d   : > { %1390 = vst [vmem:[#allocation2 + $0xe8] sm:$0xff] %v1358_v8  ;;  %v1265_v13 = vadd.f32 %v2022_v9, %v1910_v6  ;;  %v1912_v14 = vpop.f32.mrf.mxu0 }
 0x18e   : > { %v1913_v15 = vadd.f32 %v1912_v14, %v1911_v10  ;;  %v2024_v16 = vpop.f32.mrf.mxu1  ;;  %v756_v10 = vld [vmem:[#allocation2 + $0x40] sm:$0xff] }
 0x18f   : > { %v1359_v17 = vadd.f32 %v1265_v13, %v749_v11  ;;  %v2025_v18 = vadd.f32 %v2024_v16, %v2023_v12  ;;  %v1914_v19 = vpop.f32.mrf.mxu0 }
 0x190   : > { %v2026_v21 = vpop.f32.mrf.mxu1 }
 0x191   : > { %1391 = vst [vmem:[#allocation2 + $0xb8] sm:$0xff] %v1359_v17  ;;  %v1270_v22 = vadd.f32 %v2025_v18, %v1913_v15  ;;  %v1915_v23 = vpop.f32.mrf.mxu0 }
 0x192   : > { %v1916_v24 = vadd.f32 %v1915_v23, %v1914_v19  ;;  %v2027_v25 = vpop.f32.mrf.mxu1  ;;  %v757_v19 = vld [vmem:[#allocation2 + $0xc8] sm:$0xff] }
 0x193   : > { %v1360_v26 = vadd.f32 %v1270_v22, %v750_v20  ;;  %v2028_v27 = vadd.f32 %v2027_v25, %v2026_v21  ;;  %v1917_v28 = vpop.f32.mrf.mxu0 }
 0x194   : > { %v2029_v30 = vpop.f32.mrf.mxu1 }
 0x195   : > { %1392 = vst [vmem:[#allocation2 + $0x60] sm:$0xff] %v1360_v26  ;;  %v1273_v31 = vadd.f32 %v2028_v27, %v1916_v24  ;;  %v1918_v32 = vpop.f32.mrf.mxu0 }
 0x196   : > { %v1919_v33 = vadd.f32 %v1918_v32, %v1917_v28  ;;  %v2030_v34 = vpop.f32.mrf.mxu1  ;;  %v758_v28 = vld [vmem:[#allocation2 + $0xe0] sm:$0xff] }
 0x197   : > { %v1361_v35 = vadd.f32 %v1273_v31, %v751_v29  ;;  %v2031_v36 = vadd.f32 %v2030_v34, %v2029_v30  ;;  %v1920_v37 = vpop.f32.mrf.mxu0 }
 0x198   : > { %v2032_v39 = vpop.f32.mrf.mxu1 }
 0x199   : > { %1393 = vst [vmem:[#allocation2 + $0xf0] sm:$0xff] %v1361_v35  ;;  %v1278_v40 = vadd.f32 %v2031_v36, %v1919_v33  ;;  %v1921_v41 = vpop.f32.mrf.mxu0 }
 0x19a   : > { %v1922_v42 = vadd.f32 %v1921_v41, %v1920_v37  ;;  %v2033_v43 = vpop.f32.mrf.mxu1  ;;  %v759_v37 = vld [vmem:[#allocation2 + $0x90] sm:$0xff] }
 0x19b   : > { %v1362_v44 = vadd.f32 %v1278_v40, %v752_v38  ;;  %v2034_v45 = vadd.f32 %v2033_v43, %v2032_v39  ;;  %v1923_v46 = vpop.f32.mrf.mxu0 }
 0x19c   : > { %v2035_v48 = vpop.f32.mrf.mxu1 }
 0x19d   : > { %1394 = vst [vmem:[#allocation2 + $0x8] sm:$0xff] %v1362_v44  ;;  %v1281_v49 = vadd.f32 %v2034_v45, %v1922_v42  ;;  %v1924_v50 = vpop.f32.mrf.mxu0 }
 0x19e   : > { %v1925_v51 = vadd.f32 %v1924_v50, %v1923_v46  ;;  %v2036_v52 = vpop.f32.mrf.mxu1  ;;  %v760_v46 = vld [vmem:[#allocation2 + $0x70] sm:$0xff] }
 0x19f   : > { %v1363_v53 = vadd.f32 %v1281_v49, %v753_v47  ;;  %v2037_v54 = vadd.f32 %v2036_v52, %v2035_v48  ;;  %v1926_v55 = vpop.f32.mrf.mxu0 }
 0x1a0   : > { %v2038_v57 = vpop.f32.mrf.mxu1 }
 0x1a1   : > { %1395 = vst [vmem:[#allocation2 + $0x78] sm:$0xff] %v1363_v53  ;;  %v1286_v58 = vadd.f32 %v2037_v54, %v1925_v51  ;;  %v1927_v59 = vpop.f32.mrf.mxu0 }
 0x1a2   : > { %v1928_v60 = vadd.f32 %v1927_v59, %v1926_v55  ;;  %v2039_v61 = vpop.f32.mrf.mxu1  ;;  %v761_v55 = vld [vmem:[#allocation2 + $0xc0] sm:$0xff] }
 0x1a3   : > { %v1364_v62 = vadd.f32 %v1286_v58, %v754_v56  ;;  %v2040_v63 = vadd.f32 %v2039_v61, %v2038_v57  ;;  %v1929_v0 = vpop.f32.mrf.mxu0 }
 0x1a4   : > { %v2041_v2 = vpop.f32.mrf.mxu1 }
 0x1a5   : > { %1396 = vst [vmem:[#allocation2 + $0x38] sm:$0xff] %v1364_v62  ;;  %v1289_v3 = vadd.f32 %v2040_v63, %v1928_v60  ;;  %v1930_v4 = vpop.f32.mrf.mxu0 }
 0x1a6   : > { %v1931_v5 = vadd.f32 %v1930_v4, %v1929_v0  ;;  %v2042_v6 = vpop.f32.mrf.mxu1  ;;  %v762_v0 = vld [vmem:[#allocation2 + $0xa8] sm:$0xff] }
 0x1a7   : > { %v1365_v7 = vadd.f32 %v1289_v3, %v755_v1  ;;  %v2043_v8 = vadd.f32 %v2042_v6, %v2041_v2  ;;  %v1932_v9 = vpop.f32.mrf.mxu0 }
 0x1a8   : > { %v2044_v11 = vpop.f32.mrf.mxu1 }
 0x1a9   : > { %1397 = vst [vmem:[#allocation2 + $0x58] sm:$0xff] %v1365_v7  ;;  %v1294_v12 = vadd.f32 %v2043_v8, %v1931_v5  ;;  %v1933_v13 = vpop.f32.mrf.mxu0 }
 0x1aa   : > { %v1934_v14 = vadd.f32 %v1933_v13, %v1932_v9  ;;  %v2045_v15 = vpop.f32.mrf.mxu1  ;;  %v763_v9 = vld [vmem:[#allocation2 + $0xd0] sm:$0xff] }
 0x1ab   : > { %v1366_v16 = vadd.f32 %v1294_v12, %v756_v10  ;;  %v2046_v17 = vadd.f32 %v2045_v15, %v2044_v11  ;;  %v1935_v18 = vpop.f32.mrf.mxu0 }
 0x1ac   : > { %v2047_v20 = vpop.f32.mrf.mxu1 }
 0x1ad   : > { %1398 = vst [vmem:[#allocation2 + $0x40] sm:$0xff] %v1366_v16  ;;  %v1297_v21 = vadd.f32 %v2046_v17, %v1934_v14  ;;  %v1936_v22 = vpop.f32.mrf.mxu0 }
 0x1ae   : > { %v1937_v23 = vadd.f32 %v1936_v22, %v1935_v18  ;;  %v2048_v24 = vpop.f32.mrf.mxu1  ;;  %v764_v18 = vld [vmem:[#allocation2 + $0x10] sm:$0xff] }
 0x1af   : > { %v1367_v25 = vadd.f32 %v1297_v21, %v757_v19  ;;  %v2049_v26 = vadd.f32 %v2048_v24, %v2047_v20  ;;  %v1938_v27 = vpop.f32.mrf.mxu0 }
 0x1b0   : > { %v2050_v29 = vpop.f32.mrf.mxu1 }
 0x1b1   : > { %1399 = vst [vmem:[#allocation2 + $0xc8] sm:$0xff] %v1367_v25  ;;  %v1302_v30 = vadd.f32 %v2049_v26, %v1937_v23  ;;  %v1939_v31 = vpop.f32.mrf.mxu0 }
 0x1b2   : > { %v1940_v32 = vadd.f32 %v1939_v31, %v1938_v27  ;;  %v2051_v33 = vpop.f32.mrf.mxu1  ;;  %v765_v27 = vld [vmem:[#allocation2 + $0x28] sm:$0xff] }
 0x1b3   : > { %v1368_v34 = vadd.f32 %v1302_v30, %v758_v28  ;;  %v2052_v35 = vadd.f32 %v2051_v33, %v2050_v29  ;;  %v1941_v36 = vpop.f32.mrf.mxu0 }
 0x1b4   : > { %v2053_v38 = vpop.f32.mrf.mxu1 }
 0x1b5   : > { %1400 = vst [vmem:[#allocation2 + $0xe0] sm:$0xff] %v1368_v34  ;;  %v1305_v39 = vadd.f32 %v2052_v35, %v1940_v32  ;;  %v1942_v40 = vpop.f32.mrf.mxu0 }
 0x1b6   : > { %v1943_v41 = vadd.f32 %v1942_v40, %v1941_v36  ;;  %v2054_v42 = vpop.f32.mrf.mxu1  ;;  %v766_v36 = vld [vmem:[#allocation2 + $0xa0] sm:$0xff] }
 0x1b7   : > { %v1369_v43 = vadd.f32 %v1305_v39, %v759_v37  ;;  %v2055_v44 = vadd.f32 %v2054_v42, %v2053_v38  ;;  %v1944_v45 = vpop.f32.mrf.mxu0 }
 0x1b8   : > { %v2056_v47 = vpop.f32.mrf.mxu1 }
 0x1b9   : > { %1401 = vst [vmem:[#allocation2 + $0x90] sm:$0xff] %v1369_v43  ;;  %v1310_v48 = vadd.f32 %v2055_v44, %v1943_v41  ;;  %v1945_v49 = vpop.f32.mrf.mxu0 }
 0x1ba   : > { %v1946_v50 = vadd.f32 %v1945_v49, %v1944_v45  ;;  %v2057_v51 = vpop.f32.mrf.mxu1  ;;  %v767_v45 = vld [vmem:[#allocation2 + $0xf8] sm:$0xff] }
 0x1bb   : > { %v1370_v52 = vadd.f32 %v1310_v48, %v760_v46  ;;  %v2058_v53 = vadd.f32 %v2057_v51, %v2056_v47  ;;  %v1947_v54 = vpop.f32.mrf.mxu0 }
 0x1bc   : > { %v2059_v56 = vpop.f32.mrf.mxu1 }
 0x1bd   : > { %1402 = vst [vmem:[#allocation2 + $0x70] sm:$0xff] %v1370_v52  ;;  %v1313_v57 = vadd.f32 %v2058_v53, %v1946_v50  ;;  %v1948_v58 = vpop.f32.mrf.mxu0 }
 0x1be   : > { %v1949_v59 = vadd.f32 %v1948_v58, %v1947_v54  ;;  %v2060_v60 = vpop.f32.mrf.mxu1  ;;  %v768_v54 = vld [vmem:[#allocation2 + $0x20] sm:$0xff] }
 0x1bf   : > { %v1371_v61 = vadd.f32 %v1313_v57, %v761_v55  ;;  %v2061_v62 = vadd.f32 %v2060_v60, %v2059_v56  ;;  %v1950_v63 = vpop.f32.mrf.mxu0 }
 0x1c0   : > { %v2062_v1 = vpop.f32.mrf.mxu1 }
 0x1c1   : > { %1403 = vst [vmem:[#allocation2 + $0xc0] sm:$0xff] %v1371_v61  ;;  %v1318_v2 = vadd.f32 %v2061_v62, %v1949_v59  ;;  %v1951_v3 = vpop.f32.mrf.mxu0  ;;  %v769_v62 = vld [vmem:[#allocation2 + $0x98] sm:$0xff] }
 0x1c2   : > { %v1952_v4 = vadd.f32 %v1951_v3, %v1950_v63  ;;  %v2063_v5 = vpop.f32.mrf.mxu1 }
 0x1c3   : > { %v1372_v6 = vadd.f32 %v1318_v2, %v762_v0  ;;  %v2064_v7 = vadd.f32 %v2063_v5, %v2062_v1  ;;  %v1953_v8 = vpop.f32.mrf.mxu0 }
 0x1c4   : > { %v2065_v10 = vpop.f32.mrf.mxu1 }
 0x1c5   : > { %1404 = vst [vmem:[#allocation2 + $0xa8] sm:$0xff] %v1372_v6  ;;  %v1321_v11 = vadd.f32 %v2064_v7, %v1952_v4  ;;  %v1954_v12 = vpop.f32.mrf.mxu0 }
 0x1c6   : > { %v1955_v13 = vadd.f32 %v1954_v12, %v1953_v8  ;;  %v2066_v14 = vpop.f32.mrf.mxu1 }
 0x1c7   : > { %v1373_v15 = vadd.f32 %v1321_v11, %v763_v9  ;;  %v2067_v16 = vadd.f32 %v2066_v14, %v2065_v10  ;;  %v1956_v17 = vpop.f32.mrf.mxu0 }
 0x1c8   : > { %v2068_v19 = vpop.f32.mrf.mxu1 }
 0x1c9   : > { %1405 = vst [vmem:[#allocation2 + $0xd0] sm:$0xff] %v1373_v15  ;;  %v1326_v20 = vadd.f32 %v2067_v16, %v1955_v13  ;;  %v1957_v21 = vpop.f32.mrf.mxu0 }
 0x1ca   : > { %v1958_v22 = vadd.f32 %v1957_v21, %v1956_v17  ;;  %v2069_v23 = vpop.f32.mrf.mxu1 }
 0x1cb   : > { %v1374_v24 = vadd.f32 %v1326_v20, %v764_v18  ;;  %v2070_v25 = vadd.f32 %v2069_v23, %v2068_v19  ;;  %v1959_v26 = vpop.f32.mrf.mxu0 }
 0x1cc   : > { %v2071_v28 = vpop.f32.mrf.mxu1 }
 0x1cd   : > { %1406 = vst [vmem:[#allocation2 + $0x10] sm:$0xff] %v1374_v24  ;;  %v1329_v29 = vadd.f32 %v2070_v25, %v1958_v22  ;;  %v1960_v30 = vpop.f32.mrf.mxu0 }
 0x1ce   : > { %v1961_v31 = vadd.f32 %v1960_v30, %v1959_v26  ;;  %v2072_v32 = vpop.f32.mrf.mxu1 }
 0x1cf   : > { %v1375_v33 = vadd.f32 %v1329_v29, %v765_v27  ;;  %v2073_v34 = vadd.f32 %v2072_v32, %v2071_v28  ;;  %v1962_v35 = vpop.f32.mrf.mxu0 }
 0x1d0   : > { %v2074_v37 = vpop.f32.mrf.mxu1 }
 0x1d1   : > { %1407 = vst [vmem:[#allocation2 + $0x28] sm:$0xff] %v1375_v33  ;;  %v1334_v38 = vadd.f32 %v2073_v34, %v1961_v31  ;;  %v1963_v39 = vpop.f32.mrf.mxu0 }
 0x1d2   : > { %v1964_v40 = vadd.f32 %v1963_v39, %v1962_v35  ;;  %v2075_v41 = vpop.f32.mrf.mxu1 }
 0x1d3   : > { %v1376_v42 = vadd.f32 %v1334_v38, %v766_v36  ;;  %v2076_v43 = vadd.f32 %v2075_v41, %v2074_v37  ;;  %v1965_v44 = vpop.f32.mrf.mxu0 }
 0x1d4   : > { %v2077_v46 = vpop.f32.mrf.mxu1 }
 0x1d5   : > { %1408 = vst [vmem:[#allocation2 + $0xa0] sm:$0xff] %v1376_v42  ;;  %v1337_v47 = vadd.f32 %v2076_v43, %v1964_v40  ;;  %v1966_v48 = vpop.f32.mrf.mxu0 }
 0x1d6   : > { %v1967_v49 = vadd.f32 %v1966_v48, %v1965_v44  ;;  %v2078_v50 = vpop.f32.mrf.mxu1 }
 0x1d7   : > { %v1377_v51 = vadd.f32 %v1337_v47, %v767_v45  ;;  %v2079_v52 = vadd.f32 %v2078_v50, %v2077_v46  ;;  %v1968_v53 = vpop.f32.mrf.mxu0 }
 0x1d8   : > { %v2080_v55 = vpop.f32.mrf.mxu1 }
 0x1d9   : > { %1409 = vst [vmem:[#allocation2 + $0xf8] sm:$0xff] %v1377_v51  ;;  %v1342_v56 = vadd.f32 %v2079_v52, %v1967_v49  ;;  %v1969_v57 = vpop.f32.mrf.mxu0 }
 0x1da   : > { %v1970_v58 = vadd.f32 %v1969_v57, %v1968_v53  ;;  %v2081_v59 = vpop.f32.mrf.mxu1 }
 0x1db   : > { %v1378_v60 = vadd.f32 %v1342_v56, %v768_v54  ;;  %v2082_v61 = vadd.f32 %v2081_v59, %v2080_v55 }
 0x1dd   : > { %1410 = vst [vmem:[#allocation2 + $0x20] sm:$0xff] %v1378_v60  ;;  %v1345_v63 = vadd.f32 %v2082_v61, %v1970_v58  ;;  %1415 = sbr.rel (%p1855_p13) target bundleno = 671 (0x29f), region = 63 }
 0x1df   : > { %v1379_v0 = vadd.f32 %v1345_v63, %v769_v62 }
 0x1e1   : > { %1411 = vst [vmem:[#allocation2 + $0x98] sm:$0xff] %v1379_v0 }
 0x1e2   : > { %v1418_v1 = vld [vmem:[%s2586_s30 + $0x10] sm:$0xff]  ;;  %v1416_v2 = vld [vmem:[%s2586_s30] sm:$0xff]  ;;  %v2232_v3 = vmov 0   ;;  %v1419_v4 = vld [vmem:[%s2586_s30 + $0x18] sm:$0xff] }
 0x1e3   : > { %2174 = vset.pattern.permute.xlu1 %v2232_v3  ;;  %2173 = vset.pattern.permute.xlu0 %v2232_v3  ;;  %v1417_v5 = vld [vmem:[%s2586_s30 + $0x8] sm:$0xff]  ;;  %v1420_v7 = vld [vmem:[%s2586_s30 + $0x20] sm:$0xff]  ;;  %v1423_v8 = vld [vmem:[%s2586_s30 + $0x38] sm:$0xff] }
 0x1e4   : > { %1492 = vperm.xlu1 %2174, %v1418_v1   ;;  %1482 = vperm.xlu0 %2173, %v1416_v2   ;;  %v1421_v6 = vld [vmem:[%s2586_s30 + $0x28] sm:$0xff]  ;;  %v1422_v9 = vld [vmem:[%s2586_s30 + $0x30] sm:$0xff]  ;;  %v1424_v11 = vld [vmem:[%s2586_s30 + $0x40] sm:$0xff] }
 0x1e5   : > { %v1425_v10 = vld [vmem:[%s2586_s30 + $0x48] sm:$0xff]  ;;  %v1427_v12 = vld [vmem:[%s2586_s30 + $0x58] sm:$0xff]  ;;  %v1426_v13 = vld [vmem:[%s2586_s30 + $0x50] sm:$0xff] }
 0x1e6   : > { %v1429_v14 = vld [vmem:[%s2586_s30 + $0x68] sm:$0xff]  ;;  %v1428_v15 = vld [vmem:[%s2586_s30 + $0x60] sm:$0xff]  ;;  %v1431_v16 = vld [vmem:[%s2586_s30 + $0x78] sm:$0xff] }
 0x1e7   : > { %v1430_v17 = vld [vmem:[%s2586_s30 + $0x70] sm:$0xff]  ;;  %v1433_v18 = vld [vmem:[%s2586_s30 + $0x88] sm:$0xff]  ;;  %v1432_v19 = vld [vmem:[%s2586_s30 + $0x80] sm:$0xff] }
 0x1e8   : > { %1497 = vperm.xlu1 %2174, %v1419_v4   ;;  %1487 = vperm.xlu0 %2173, %v1417_v5   ;;  %v1435_v20 = vld [vmem:[%s2586_s30 + $0x98] sm:$0xff]  ;;  %v1434_v21 = vld [vmem:[%s2586_s30 + $0x90] sm:$0xff]  ;;  %v1437_v22 = vld [vmem:[%s2586_s30 + $0xa8] sm:$0xff] }
 0x1e9   : > { %v1436_v23 = vld [vmem:[%s2586_s30 + $0xa0] sm:$0xff]  ;;  %v1439_v24 = vld [vmem:[%s2586_s30 + $0xb8] sm:$0xff]  ;;  %v1438_v25 = vld [vmem:[%s2586_s30 + $0xb0] sm:$0xff] }
 0x1ea   : > { %v1441_v26 = vld [vmem:[%s2586_s30 + $0xc8] sm:$0xff]  ;;  %v1440_v27 = vld [vmem:[%s2586_s30 + $0xc0] sm:$0xff]  ;;  %v1443_v28 = vld [vmem:[%s2586_s30 + $0xd8] sm:$0xff] }
 0x1eb   : > { %v1442_v29 = vld [vmem:[%s2586_s30 + $0xd0] sm:$0xff]  ;;  %v1445_v30 = vld [vmem:[%s2586_s30 + $0xe8] sm:$0xff]  ;;  %v1444_v31 = vld [vmem:[%s2586_s30 + $0xe0] sm:$0xff] }
 0x1ec   : > { %1507 = vperm.xlu1 %2174, %v1421_v6   ;;  %1502 = vperm.xlu0 %2173, %v1420_v7   ;;  %v1447_v32 = vld [vmem:[%s2586_s30 + $0xf8] sm:$0xff]  ;;  %v1446_v33 = vld [vmem:[%s2586_s30 + $0xf0] sm:$0xff]  ;;  %v1449_v41 = vld [vmem:[#allocation2] sm:$0xff] }
 0x1ed   : > { %v1450_v34 = vld [vmem:[#allocation2 + $0xd8] sm:$0xff]  ;;  %v1448_v35 = vld [vmem:[#allocation2 + $0xb0] sm:$0xff]  ;;  %v1453_v46 = vld [vmem:[#allocation2 + $0x68] sm:$0xff] }
 0x1ee   : > { %v1451_v40 = vld [vmem:[#allocation2 + $0x18] sm:$0xff]  ;;  %v1452_v47 = vld [vmem:[#allocation2 + $0x50] sm:$0xff]  ;;  %v1455_v52 = vld [vmem:[#allocation2 + $0x48] sm:$0xff] }
 0x1ef   : > { %v1454_v53 = vld [vmem:[#allocation2 + $0x30] sm:$0xff]  ;;  %v1457_v58 = vld [vmem:[#allocation2 + $0x88] sm:$0xff]  ;;  %v1456_v59 = vld [vmem:[#allocation2 + $0x80] sm:$0xff] }
 0x1f0   : > { %1517 = vperm.xlu1 %2174, %v1423_v8   ;;  %1512 = vperm.xlu0 %2173, %v1422_v9   ;;  %v1459_v0 = vld [vmem:[#allocation2 + $0xb8] sm:$0xff]  ;;  %v1458_v1 = vld [vmem:[#allocation2 + $0xe8] sm:$0xff]  ;;  %v1461_v6 = vld [vmem:[#allocation2 + $0xf0] sm:$0xff] }
 0x1f1   : > { %v1460_v7 = vld [vmem:[#allocation2 + $0x60] sm:$0xff] }
 0x1f4   : > { %1527 = vperm.xlu1 %2174, %v1425_v10   ;;  %1522 = vperm.xlu0 %2173, %v1424_v11  }
 0x1f8   : > { %1537 = vperm.xlu1 %2174, %v1427_v12   ;;  %1532 = vperm.xlu0 %2173, %v1426_v13   ;;  %v1463_v12 = vld [vmem:[#allocation2 + $0x78] sm:$0xff]  ;;  %v1462_v13 = vld [vmem:[#allocation2 + $0x8] sm:$0xff] }
 0x1fc   : > { %1547 = vperm.xlu1 %2174, %v1429_v14   ;;  %1542 = vperm.xlu0 %2173, %v1428_v15  }
 0x200   : > { %1557 = vperm.xlu1 %2174, %v1431_v16   ;;  %1552 = vperm.xlu0 %2173, %v1430_v17  }
 0x204   : > { %1567 = vperm.xlu1 %2174, %v1433_v18   ;;  %1562 = vperm.xlu0 %2173, %v1432_v19   ;;  %v1465_v18 = vld [vmem:[#allocation2 + $0x58] sm:$0xff] }
 0x205   : > { %v1464_v19 = vld [vmem:[#allocation2 + $0x38] sm:$0xff] }
 0x208   : > { %1577 = vperm.xlu1 %2174, %v1435_v20   ;;  %1572 = vperm.xlu0 %2173, %v1434_v21  }
 0x20c   : > { %1587 = vperm.xlu1 %2174, %v1437_v22   ;;  %1582 = vperm.xlu0 %2173, %v1436_v23  }
 0x210   : > { %1597 = vperm.xlu1 %2174, %v1439_v24   ;;  %1592 = vperm.xlu0 %2173, %v1438_v25   ;;  %v1467_v24 = vld [vmem:[#allocation2 + $0xc8] sm:$0xff]  ;;  %v1466_v25 = vld [vmem:[#allocation2 + $0x40] sm:$0xff] }
 0x214   : > { %1607 = vperm.xlu1 %2174, %v1441_v26   ;;  %1602 = vperm.xlu0 %2173, %v1440_v27  }
 0x218   : > { %1617 = vperm.xlu1 %2174, %v1443_v28   ;;  %1612 = vperm.xlu0 %2173, %v1442_v29  }
 0x21c   : > { %1627 = vperm.xlu1 %2174, %v1445_v30   ;;  %1622 = vperm.xlu0 %2173, %v1444_v31   ;;  %v1469_v30 = vld [vmem:[#allocation2 + $0x90] sm:$0xff]  ;;  %v1468_v31 = vld [vmem:[#allocation2 + $0xe0] sm:$0xff] }
 0x220   : > { %1637 = vperm.xlu1 %2174, %v1447_v32   ;;  %1632 = vperm.xlu0 %2173, %v1446_v33  }
 0x25f   : > { %v1493_v36 = vpop.permute.xlu1 %1492  ;;  %v1483_v37 = vpop.permute.xlu0 %1482 }
 0x260   : > { %v1642_v38 = vmul.f32 %v1493_v36, %v1450_v34  ;;  %v1640_v39 = vmul.f32 %v1483_v37, %v1448_v35  ;;  %v1471_v36 = vld [vmem:[#allocation2 + $0xc0] sm:$0xff]  ;;  %v1470_v37 = vld [vmem:[#allocation2 + $0x70] sm:$0xff] }
 0x262   : > { %1674 = vst [vmem:[%s2591_s5 + $0x10] sm:$0xff] %v1642_v38  ;;  %1672 = vst [vmem:[%s2591_s5] sm:$0xff] %v1640_v39 }
 0x263   : > { %v1498_v42 = vpop.permute.xlu1 %1497  ;;  %v1488_v43 = vpop.permute.xlu0 %1487 }
 0x264   : > { %v1643_v44 = vmul.f32 %v1498_v42, %v1451_v40  ;;  %v1641_v45 = vmul.f32 %v1488_v43, %v1449_v41  ;;  %v1473_v42 = vld [vmem:[#allocation2 + $0xd0] sm:$0xff]  ;;  %v1472_v43 = vld [vmem:[#allocation2 + $0xa8] sm:$0xff] }
 0x266   : > { %1675 = vst [vmem:[%s2591_s5 + $0x18] sm:$0xff] %v1643_v44  ;;  %1673 = vst [vmem:[%s2591_s5 + $0x8] sm:$0xff] %v1641_v45 }
 0x267   : > { %v1508_v48 = vpop.permute.xlu1 %1507  ;;  %v1503_v49 = vpop.permute.xlu0 %1502 }
 0x268   : > { %v1645_v50 = vmul.f32 %v1508_v48, %v1453_v46  ;;  %v1644_v51 = vmul.f32 %v1503_v49, %v1452_v47  ;;  %v1475_v48 = vld [vmem:[#allocation2 + $0x28] sm:$0xff]  ;;  %v1474_v49 = vld [vmem:[#allocation2 + $0x10] sm:$0xff] }
 0x26a   : > { %1677 = vst [vmem:[%s2591_s5 + $0x28] sm:$0xff] %v1645_v50  ;;  %1676 = vst [vmem:[%s2591_s5 + $0x20] sm:$0xff] %v1644_v51 }
 0x26b   : > { %v1518_v54 = vpop.permute.xlu1 %1517  ;;  %v1513_v55 = vpop.permute.xlu0 %1512 }
 0x26c   : > { %v1647_v56 = vmul.f32 %v1518_v54, %v1455_v52  ;;  %v1646_v57 = vmul.f32 %v1513_v55, %v1454_v53  ;;  %v1477_v54 = vld [vmem:[#allocation2 + $0xf8] sm:$0xff]  ;;  %v1476_v55 = vld [vmem:[#allocation2 + $0xa0] sm:$0xff] }
 0x26e   : > { %1679 = vst [vmem:[%s2591_s5 + $0x38] sm:$0xff] %v1647_v56  ;;  %1678 = vst [vmem:[%s2591_s5 + $0x30] sm:$0xff] %v1646_v57 }
 0x26f   : > { %v1528_v60 = vpop.permute.xlu1 %1527  ;;  %v1523_v61 = vpop.permute.xlu0 %1522 }
 0x270   : > { %v1649_v62 = vmul.f32 %v1528_v60, %v1457_v58  ;;  %v1648_v63 = vmul.f32 %v1523_v61, %v1456_v59  ;;  %v1479_v60 = vld [vmem:[#allocation2 + $0x98] sm:$0xff]  ;;  %v1478_v61 = vld [vmem:[#allocation2 + $0x20] sm:$0xff] }
 0x272   : > { %1681 = vst [vmem:[%s2591_s5 + $0x48] sm:$0xff] %v1649_v62  ;;  %1680 = vst [vmem:[%s2591_s5 + $0x40] sm:$0xff] %v1648_v63 }
 0x273   : > { %v1538_v2 = vpop.permute.xlu1 %1537  ;;  %v1533_v3 = vpop.permute.xlu0 %1532 }
 0x274   : > { %v1651_v4 = vmul.f32 %v1538_v2, %v1459_v0  ;;  %v1650_v5 = vmul.f32 %v1533_v3, %v1458_v1 }
 0x276   : > { %1683 = vst [vmem:[%s2591_s5 + $0x58] sm:$0xff] %v1651_v4  ;;  %1682 = vst [vmem:[%s2591_s5 + $0x50] sm:$0xff] %v1650_v5 }
 0x277   : > { %v1548_v8 = vpop.permute.xlu1 %1547  ;;  %v1543_v9 = vpop.permute.xlu0 %1542 }
 0x278   : > { %v1653_v10 = vmul.f32 %v1548_v8, %v1461_v6  ;;  %v1652_v11 = vmul.f32 %v1543_v9, %v1460_v7 }
 0x27a   : > { %1685 = vst [vmem:[%s2591_s5 + $0x68] sm:$0xff] %v1653_v10  ;;  %1684 = vst [vmem:[%s2591_s5 + $0x60] sm:$0xff] %v1652_v11 }
 0x27b   : > { %v1558_v14 = vpop.permute.xlu1 %1557  ;;  %v1553_v15 = vpop.permute.xlu0 %1552 }
 0x27c   : > { %v1655_v16 = vmul.f32 %v1558_v14, %v1463_v12  ;;  %v1654_v17 = vmul.f32 %v1553_v15, %v1462_v13 }
 0x27e   : > { %1687 = vst [vmem:[%s2591_s5 + $0x78] sm:$0xff] %v1655_v16  ;;  %1686 = vst [vmem:[%s2591_s5 + $0x70] sm:$0xff] %v1654_v17 }
 0x27f   : > { %v1568_v20 = vpop.permute.xlu1 %1567  ;;  %v1563_v21 = vpop.permute.xlu0 %1562 }
 0x280   : > { %v1657_v22 = vmul.f32 %v1568_v20, %v1465_v18  ;;  %v1656_v23 = vmul.f32 %v1563_v21, %v1464_v19 }
 0x282   : > { %1689 = vst [vmem:[%s2591_s5 + $0x88] sm:$0xff] %v1657_v22  ;;  %1688 = vst [vmem:[%s2591_s5 + $0x80] sm:$0xff] %v1656_v23 }
 0x283   : > { %v1578_v26 = vpop.permute.xlu1 %1577  ;;  %v1573_v27 = vpop.permute.xlu0 %1572 }
 0x284   : > { %v1659_v28 = vmul.f32 %v1578_v26, %v1467_v24  ;;  %v1658_v29 = vmul.f32 %v1573_v27, %v1466_v25 }
 0x286   : > { %1691 = vst [vmem:[%s2591_s5 + $0x98] sm:$0xff] %v1659_v28  ;;  %1690 = vst [vmem:[%s2591_s5 + $0x90] sm:$0xff] %v1658_v29 }
 0x287   : > { %v1588_v32 = vpop.permute.xlu1 %1587  ;;  %v1583_v33 = vpop.permute.xlu0 %1582 }
 0x288   : > { %v1661_v34 = vmul.f32 %v1588_v32, %v1469_v30  ;;  %v1660_v35 = vmul.f32 %v1583_v33, %v1468_v31 }
 0x28a   : > { %1693 = vst [vmem:[%s2591_s5 + $0xa8] sm:$0xff] %v1661_v34  ;;  %1692 = vst [vmem:[%s2591_s5 + $0xa0] sm:$0xff] %v1660_v35 }
 0x28b   : > { %v1598_v38 = vpop.permute.xlu1 %1597  ;;  %v1593_v39 = vpop.permute.xlu0 %1592 }
 0x28c   : > { %v1663_v40 = vmul.f32 %v1598_v38, %v1471_v36  ;;  %v1662_v41 = vmul.f32 %v1593_v39, %v1470_v37 }
 0x28e   : > { %1695 = vst [vmem:[%s2591_s5 + $0xb8] sm:$0xff] %v1663_v40  ;;  %1694 = vst [vmem:[%s2591_s5 + $0xb0] sm:$0xff] %v1662_v41 }
 0x28f   : > { %v1608_v44 = vpop.permute.xlu1 %1607  ;;  %v1603_v45 = vpop.permute.xlu0 %1602 }
 0x290   : > { %v1665_v46 = vmul.f32 %v1608_v44, %v1473_v42  ;;  %v1664_v47 = vmul.f32 %v1603_v45, %v1472_v43 }
 0x292   : > { %1697 = vst [vmem:[%s2591_s5 + $0xc8] sm:$0xff] %v1665_v46  ;;  %1696 = vst [vmem:[%s2591_s5 + $0xc0] sm:$0xff] %v1664_v47 }
 0x293   : > { %v1618_v50 = vpop.permute.xlu1 %1617  ;;  %v1613_v51 = vpop.permute.xlu0 %1612 }
 0x294   : > { %v1667_v52 = vmul.f32 %v1618_v50, %v1475_v48  ;;  %v1666_v53 = vmul.f32 %v1613_v51, %v1474_v49 }
 0x296   : > { %1699 = vst [vmem:[%s2591_s5 + $0xd8] sm:$0xff] %v1667_v52  ;;  %1698 = vst [vmem:[%s2591_s5 + $0xd0] sm:$0xff] %v1666_v53 }
 0x297   : > { %v1628_v56 = vpop.permute.xlu1 %1627  ;;  %v1623_v57 = vpop.permute.xlu0 %1622 }
 0x298   : > { %v1669_v58 = vmul.f32 %v1628_v56, %v1477_v54  ;;  %v1668_v59 = vmul.f32 %v1623_v57, %v1476_v55 }
 0x29a   : > { %1701 = vst [vmem:[%s2591_s5 + $0xe8] sm:$0xff] %v1669_v58  ;;  %1700 = vst [vmem:[%s2591_s5 + $0xe0] sm:$0xff] %v1668_v59 }
 0x29b   : > { %v1638_v62 = vpop.permute.xlu1 %1637  ;;  %v1633_v63 = vpop.permute.xlu0 %1632 }
 0x29c   : > { %v1671_v0 = vmul.f32 %v1638_v62, %v1479_v60  ;;  %v1670_v1 = vmul.f32 %v1633_v63, %v1478_v61 }
 0x29e   : > { %1703 = vst [vmem:[%s2591_s5 + $0xf8] sm:$0xff] %v1671_v0  ;;  %1702 = vst [vmem:[%s2591_s5 + $0xf0] sm:$0xff] %v1670_v1 }
 0x29f PF: > { %s13_s18 = sadd.s32 1, %s2229_s18   ;;  %s2846_s12 = smov %s2209_s13 }
 0x2a0   : > { %p10_p0 = scmp.ge.s32.totalorder %s13_s18, 10   ;;  %s2847_s13 = smov %s2304_s25 }
 0x2a1   : > { %s2848_s14 = smov %s2221_s16  ;;  %s2849_s15 = smov %s2225_s17 }
 0x2a2   : > { %s2850_s16 = smov %s2853_s19  ;;  %s2851_s17 = smov %s2857_s20 }
 0x2a3   :  { %12 = sbr.rel (!%p10_p0) target bundleno = 4 (0x4), region = 104 }

</bundles_post_ra>
